<compile_context>
chip_gen: v6e
topology: v6e:2x2x1
jax: 0.10.0
libtpu: 0.0.40
codegen_flags: <defaults>
</compile_context>

<pallas_src>
import functools
import math

import jax
import jax.numpy as jnp
from jax.experimental import pallas as pl
from jax.experimental.pallas import tpu as pltpu


def _layer_norm(x, g, b, eps=1e-5):
    # two-pass variance (mean of squared deviations) for numerical safety
    mu = jnp.mean(x, axis=-1, keepdims=True)
    xc = x - mu
    var = jnp.mean(xc * xc, axis=-1, keepdims=True)
    return xc * jax.lax.rsqrt(var + eps) * g + b


def _decoder_layer_kernel(*refs, n_heads, causal_self, full_enc_mask):
    in_refs = refs[:-3]
    y_ref, a1_ref, a2_ref = refs[-3:]

    it = iter(in_refs)
    x_ref = next(it)
    m1_ref = None if causal_self else next(it)
    m2_ref = None if full_enc_mask else next(it)
    (wqkv1_ref, bqkv1_ref, wo1_ref, bo1_ref, g1_ref, lb1_ref,
     wqkv2_ref, bqkv2_ref, wo2_ref, bo2_ref, g2_ref, lb2_ref,
     wf1_ref, bf1_ref, wf2_ref, bf2_ref, g3_ref, lb3_ref) = it

    _, S, D = x_ref.shape
    H = n_heads
    dk = D // H

    def mha(xb, xf, bias, wqkv_ref, bqkv_ref, wo_ref, bo_ref, g_ref, lb_ref, a_ref):
        # fused QKV projection: one (S,D)@(D,3D) bf16 matmul, f32 accumulate.
        # (the 1/sqrt(dk) softmax scale is pre-folded into the Q columns.)
        qkv = jnp.dot(xb, wqkv_ref[...],
                      preferred_element_type=jnp.float32) + bqkv_ref[...]     # (S,3D) f32

        # per-head views via cheap lane slices (layout plumbing only; all the
        # matmuls below are fused / head-batched).
        def split_heads(base):                                                # -> (H,S,dk) f32
            return jnp.stack(
                [qkv[:, base + hh * dk: base + (hh + 1) * dk] for hh in range(H)],
                axis=0)

        qh = split_heads(0)
        kh = split_heads(D)
        vh = split_heads(2 * D)

        s = jnp.einsum("hqd,hkd->hqk",
                       qh.astype(jnp.bfloat16), kh.astype(jnp.bfloat16),
                       preferred_element_type=jnp.float32)                    # (H,S,S) f32
        if bias is not None:
            s = s + bias                                                      # (S,S) broadcast
        m = jnp.max(s, axis=-1, keepdims=True)
        e = jnp.exp(s - m)
        p = e * pl.reciprocal(jnp.sum(e, axis=-1, keepdims=True), approx=True)
        a_ref[0] = p.astype(a_ref.dtype)                                      # one bulk bf16 store

        ctx = jnp.einsum("hqk,hkd->hqd",
                         p.astype(jnp.bfloat16), vh.astype(jnp.bfloat16),
                         preferred_element_type=jnp.float32)                  # (H,S,dk) f32
        # head-major (S,D) slab, then ONE output-projection matmul: the head
        # reduction happens inside the MXU accumulator.
        ctx2 = jnp.concatenate([ctx[hh] for hh in range(H)], axis=-1)         # (S,D) f32
        out = jnp.dot(ctx2.astype(jnp.bfloat16), wo_ref[...],
                      preferred_element_type=jnp.float32) + bo_ref[...]       # (S,D) f32
        # dropout (p=0.1) is identity in eval mode
        y = _layer_norm(out + xf, g_ref[...], lb_ref[...])
        return y.astype(jnp.bfloat16), y

    # additive attention biases (0 keep / -1e9 masked)
    if causal_self:
        row = jax.lax.broadcasted_iota(jnp.int32, (S, S), 0)
        col = jax.lax.broadcasted_iota(jnp.int32, (S, S), 1)
        bias1 = jnp.where(row >= col, 0.0, -1e9).astype(jnp.float32)
    else:
        bias1 = jnp.where(m1_ref[0] == 0, -1e9, 0.0).astype(jnp.float32)
    bias2 = (None if full_enc_mask
             else jnp.where(m2_ref[0] == 0, -1e9, 0.0).astype(jnp.float32))

    xb0 = x_ref[0]                          # (S,D) bf16 (cast once in the wrapper)
    xf0 = xb0.astype(jnp.float32)           # f32 residual base

    # 1) masked self-attention
    xb1, xf1 = mha(xb0, xf0, bias1, wqkv1_ref, bqkv1_ref, wo1_ref, bo1_ref,
                   g1_ref, lb1_ref, a1_ref)
    # 2) "encoder" self-attention (module passes query=key=value=x, per reference)
    xb2, xf2 = mha(xb1, xf1, bias2, wqkv2_ref, bqkv2_ref, wo2_ref, bo2_ref,
                   g2_ref, lb2_ref, a2_ref)
    # 3) positionwise feed-forward + residual + LayerNorm
    h = jnp.maximum(
        jnp.dot(xb2, wf1_ref[...], preferred_element_type=jnp.float32)
        + bf1_ref[...], 0.0)
    ffn = jnp.dot(h.astype(jnp.bfloat16), wf2_ref[...],
                  preferred_element_type=jnp.float32) + bf2_ref[...]
    y_ref[0] = _layer_norm(ffn + xf2, g3_ref[...], lb3_ref[...]).astype(y_ref.dtype)


def decoder_layer(x, mask_self, mask_enc, params, *, n_heads,
                  causal_self=False, full_enc_mask=False):
    B, S, D = x.shape
    dk = D // n_heads
    scale = 1.0 / math.sqrt(dk)
    f32, bf16 = jnp.float32, jnp.bfloat16

    # ---- wrapper-side parameter prep (layout plumbing, zero in-kernel cost) --
    def prep_qkv(w, b):
        # fold the softmax 1/sqrt(dk) scale into the Q columns; bf16 weights
        w = jnp.concatenate([w[:, :D] * scale, w[:, D:]], axis=1).astype(bf16)
        b = jnp.concatenate([b[:, :D] * scale, b[:, D:]], axis=1).astype(f32)
        return w, b

    wqkv1, bqkv1 = prep_qkv(params["wqkv1"], params["bqkv1"])
    wqkv2, bqkv2 = prep_qkv(params["wqkv2"], params["bqkv2"])

    weights = [
        wqkv1, bqkv1, params["wo1"].astype(bf16), params["bo1"].astype(f32),
        params["g1"].astype(f32), params["be1"].astype(f32),
        wqkv2, bqkv2, params["wo2"].astype(bf16), params["bo2"].astype(f32),
        params["g2"].astype(f32), params["be2"].astype(f32),
        params["w1"].astype(bf16), params["b1"].astype(f32),
        params["w2"].astype(bf16), params["b2"].astype(f32),
        params["g3"].astype(f32), params["be3"].astype(f32),
    ]

    kernel = functools.partial(_decoder_layer_kernel, n_heads=n_heads,
                               causal_self=causal_self, full_enc_mask=full_enc_mask)

    x_spec = pl.BlockSpec((1, S, D), lambda b: (b, 0, 0))
    m_spec = pl.BlockSpec((1, S, S), lambda b: (b, 0, 0))
    a_spec = pl.BlockSpec((1, n_heads, S, S), lambda b: (b, 0, 0, 0))

    def full_spec(arr):
        zeros = (0,) * arr.ndim
        return pl.BlockSpec(arr.shape, lambda b, z=zeros: z)

    inputs = [x.astype(bf16)]           # cast activations once, in the wrapper
    in_specs = [x_spec]
    if not causal_self:                  # general arbitrary-mask path (bf16 DMA)
        inputs.append(mask_self.astype(bf16))
        in_specs.append(m_spec)
    if not full_enc_mask:
        inputs.append(mask_enc.astype(bf16))
        in_specs.append(m_spec)
    inputs += weights
    in_specs += [full_spec(w) for w in weights]

    out_shape = (
        jax.ShapeDtypeStruct((B, S, D), jnp.float32),
        jax.ShapeDtypeStruct((B, n_heads, S, S), jnp.bfloat16),   # attn probs bf16
        jax.ShapeDtypeStruct((B, n_heads, S, S), jnp.bfloat16),
    )

    return pl.pallas_call(
        kernel,
        out_shape=out_shape,
        grid_spec=pltpu.PrefetchScalarGridSpec(
            num_scalar_prefetch=0,
            grid=(B,),
            in_specs=in_specs,
            out_specs=[x_spec, a_spec, a_spec],
        ),
        compiler_params=pltpu.CompilerParams(
            dimension_semantics=("parallel",),   # spans both v7x TensorCores
        ),
    )(*inputs)


# ------------------------- pure-JAX reference (f32) -------------------------
def _ref_mha(x, mask, wqkv, bqkv, wo, bo, g, be, n_heads):
    S, D = x.shape
    dk = D // n_heads
    qkv = x @ wqkv + bqkv
    q, k, v = qkv[:, :D], qkv[:, D:2 * D], qkv[:, 2 * D:]
    q = q.reshape(S, n_heads, dk).transpose(1, 0, 2)
    k = k.reshape(S, n_heads, dk).transpose(1, 0, 2)
    v = v.reshape(S, n_heads, dk).transpose(1, 0, 2)
    s = jnp.einsum("hqd,hkd->hqk", q, k) / math.sqrt(dk)
    s = jnp.where(mask[None] == 0.0, -1e9, s)
    p = jax.nn.softmax(s, axis=-1)
    ctx = jnp.einsum("hqk,hkd->hqd", p, v).transpose(1, 0, 2).reshape(S, D)
    out = ctx @ wo + bo
    return _layer_norm(out + x, g, be), p


def reference(x, m1, m2, params, n_heads):
    def per_batch(xb, m1b, m2b):
        x1, p1 = _ref_mha(xb, m1b, params["wqkv1"], params["bqkv1"][0],
                          params["wo1"], params["bo1"][0],
                          params["g1"][0], params["be1"][0], n_heads)
        x2, p2 = _ref_mha(x1, m2b, params["wqkv2"], params["bqkv2"][0],
                          params["wo2"], params["bo2"][0],
                          params["g2"][0], params["be2"][0], n_heads)
        h = jnp.maximum(x2 @ params["w1"] + params["b1"][0], 0.0)
        ffn = h @ params["w2"] + params["b2"][0]
        y = _layer_norm(ffn + x2, params["g3"][0], params["be3"][0])
        return y, p1, p2
    return jax.vmap(per_batch)(x, m1, m2)


# ----------------------------------------------------------------------------
if __name__ == "__main__":
    B, S, H, D, F = 2, 8, 4, 32, 64  # batch, seq, heads, d_model, d_ff

    key = jax.random.PRNGKey(0)
    keys = jax.random.split(key, 16)

    def dense(k, shape, scale=0.02):
        return (scale * jax.random.normal(k, shape)).astype(jnp.float32)

    params = {
        # self-attention
        "wqkv1": dense(keys[0], (D, 3 * D)), "bqkv1": dense(keys[1], (1, 3 * D)),
        "wo1": dense(keys[2], (D, D)), "bo1": dense(keys[3], (1, D)),
        "g1": jnp.ones((1, D), jnp.float32), "be1": jnp.zeros((1, D), jnp.float32),
        # "encoder" self-attention
        "wqkv2": dense(keys[4], (D, 3 * D)), "bqkv2": dense(keys[5], (1, 3 * D)),
        "wo2": dense(keys[6], (D, D)), "bo2": dense(keys[7], (1, D)),
        "g2": jnp.ones((1, D), jnp.float32), "be2": jnp.zeros((1, D), jnp.float32),
        # positionwise feed-forward
        "w1": dense(keys[8], (D, F)), "b1": dense(keys[9], (1, F)),
        "w2": dense(keys[10], (F, D)), "b2": dense(keys[11], (1, D)),
        "g3": jnp.ones((1, D), jnp.float32), "be3": jnp.zeros((1, D), jnp.float32),
    }

    x = jax.random.normal(keys[12], (B, S, D)).astype(jnp.float32)
    # causal mask for self-attention, all-ones decoder-encoder mask
    causal = jnp.tril(jnp.ones((S, S), jnp.float32))
    mask_self = jnp.broadcast_to(causal, (B, S, S)).astype(jnp.float32)
    mask_enc = jnp.ones((B, S, S), jnp.float32)

    # demo masks are exactly causal / all-ones, so use the in-kernel mask path
    y, attn1, attn2 = decoder_layer(x, mask_self, mask_enc, params, n_heads=H,
                                    causal_self=True, full_enc_mask=True)
    jax.block_until_ready((y, attn1, attn2))

    y_ref, a1_ref, a2_ref = reference(x, mask_self, mask_enc, params, H)
    # bf16 matmuls / bf16-cast input / bf16 stored probs / approx reciprocal
    # vs. an all-f32 reference -> 2e-2 tolerance
    assert jnp.allclose(y, y_ref, rtol=2e-2, atol=2e-2), "output mismatch"
    assert jnp.allclose(attn1.astype(jnp.float32), a1_ref, rtol=2e-2, atol=2e-2), \
        "attn1 mismatch"
    assert jnp.allclose(attn2.astype(jnp.float32), a2_ref, rtol=2e-2, atol=2e-2), \
        "attn2 mismatch"

    print("KERNEL_OK")
</pallas_src>

<mosaic_0001>
module attributes {stable_mosaic.version = 11 : i64} {
  func.func @_decoder_layer_kernel(%arg0: i32, %arg1: memref<1x8x32xbf16, #tpu.memory_space<vmem>>, %arg2: memref<32x96xbf16, #tpu.memory_space<vmem>>, %arg3: memref<1x96xf32, #tpu.memory_space<vmem>>, %arg4: memref<32x32xbf16, #tpu.memory_space<vmem>>, %arg5: memref<1x32xf32, #tpu.memory_space<vmem>>, %arg6: memref<1x32xf32, #tpu.memory_space<vmem>>, %arg7: memref<1x32xf32, #tpu.memory_space<vmem>>, %arg8: memref<32x96xbf16, #tpu.memory_space<vmem>>, %arg9: memref<1x96xf32, #tpu.memory_space<vmem>>, %arg10: memref<32x32xbf16, #tpu.memory_space<vmem>>, %arg11: memref<1x32xf32, #tpu.memory_space<vmem>>, %arg12: memref<1x32xf32, #tpu.memory_space<vmem>>, %arg13: memref<1x32xf32, #tpu.memory_space<vmem>>, %arg14: memref<32x64xbf16, #tpu.memory_space<vmem>>, %arg15: memref<1x64xf32, #tpu.memory_space<vmem>>, %arg16: memref<64x32xbf16, #tpu.memory_space<vmem>>, %arg17: memref<1x32xf32, #tpu.memory_space<vmem>>, %arg18: memref<1x32xf32, #tpu.memory_space<vmem>>, %arg19: memref<1x32xf32, #tpu.memory_space<vmem>>, %arg20: memref<1x8x32xf32, #tpu.memory_space<vmem>>, %arg21: memref<1x4x8x8xbf16, #tpu.memory_space<vmem>>, %arg22: memref<1x4x8x8xbf16, #tpu.memory_space<vmem>>) attributes {dimension_semantics = [#tpu.dimension_semantics<parallel>], iteration_bounds = array<i64: 2>, scalar_prefetch = 0 : i64, scratch_operands = 0 : i64, tpu.core_type = #tpu.core_type<tc>, window_params = [{transform_indices = @transform_0, window_bounds = array<i64: 1, 8, 32>}, {pipeline_mode = #tpu.pipeline_mode<synchronous>, transform_indices = @transform_1, window_bounds = array<i64: 32, 96>}, {pipeline_mode = #tpu.pipeline_mode<synchronous>, transform_indices = @transform_2, window_bounds = array<i64: 1, 96>}, {pipeline_mode = #tpu.pipeline_mode<synchronous>, transform_indices = @transform_3, window_bounds = array<i64: 32, 32>}, {pipeline_mode = #tpu.pipeline_mode<synchronous>, transform_indices = @transform_4, window_bounds = array<i64: 1, 32>}, {pipeline_mode = #tpu.pipeline_mode<synchronous>, transform_indices = @transform_5, window_bounds = array<i64: 1, 32>}, {pipeline_mode = #tpu.pipeline_mode<synchronous>, transform_indices = @transform_6, window_bounds = array<i64: 1, 32>}, {pipeline_mode = #tpu.pipeline_mode<synchronous>, transform_indices = @transform_7, window_bounds = array<i64: 32, 96>}, {pipeline_mode = #tpu.pipeline_mode<synchronous>, transform_indices = @transform_8, window_bounds = array<i64: 1, 96>}, {pipeline_mode = #tpu.pipeline_mode<synchronous>, transform_indices = @transform_9, window_bounds = array<i64: 32, 32>}, {pipeline_mode = #tpu.pipeline_mode<synchronous>, transform_indices = @transform_10, window_bounds = array<i64: 1, 32>}, {pipeline_mode = #tpu.pipeline_mode<synchronous>, transform_indices = @transform_11, window_bounds = array<i64: 1, 32>}, {pipeline_mode = #tpu.pipeline_mode<synchronous>, transform_indices = @transform_12, window_bounds = array<i64: 1, 32>}, {pipeline_mode = #tpu.pipeline_mode<synchronous>, transform_indices = @transform_13, window_bounds = array<i64: 32, 64>}, {pipeline_mode = #tpu.pipeline_mode<synchronous>, transform_indices = @transform_14, window_bounds = array<i64: 1, 64>}, {pipeline_mode = #tpu.pipeline_mode<synchronous>, transform_indices = @transform_15, window_bounds = array<i64: 64, 32>}, {pipeline_mode = #tpu.pipeline_mode<synchronous>, transform_indices = @transform_16, window_bounds = array<i64: 1, 32>}, {pipeline_mode = #tpu.pipeline_mode<synchronous>, transform_indices = @transform_17, window_bounds = array<i64: 1, 32>}, {pipeline_mode = #tpu.pipeline_mode<synchronous>, transform_indices = @transform_18, window_bounds = array<i64: 1, 32>}, {transform_indices = @transform_19, window_bounds = array<i64: 1, 8, 32>}, {transform_indices = @transform_20, window_bounds = array<i64: 1, 4, 8, 8>}, {transform_indices = @transform_21, window_bounds = array<i64: 1, 4, 8, 8>}]} {
    %0 = tpu.iota {dimensions = array<i32: 0>} : vector<8x8xi32>
    %1 = tpu.iota {dimensions = array<i32: 1>} : vector<8x8xi32>
    %2 = arith.cmpi sge, %0, %1 : vector<8x8xi32>
    %cst = arith.constant 0.000000e+00 : f32
    %cst_0 = arith.constant -1.000000e+09 : f32
    %3 = vector.broadcast %cst : f32 to vector<8x8xf32>
    %4 = vector.broadcast %cst_0 : f32 to vector<8x8xf32>
    %5 = arith.select %2, %3, %4 : vector<8x8xi1>, vector<8x8xf32>
    %c0 = arith.constant 0 : index
    %c0_1 = arith.constant 0 : index
    %c0_2 = arith.constant 0 : index
    %6 = vector.load %arg1[%c0, %c0_1, %c0_2] : memref<1x8x32xbf16, #tpu.memory_space<vmem>>, vector<1x8x32xbf16>
    %7 = vector.shape_cast %6 : vector<1x8x32xbf16> to vector<8x32xbf16>
    %8 = arith.extf %7 : vector<8x32xbf16> to vector<8x32xf32>
    %c0_3 = arith.constant 0 : index
    %c0_4 = arith.constant 0 : index
    %9 = vector.load %arg2[%c0_3, %c0_4] : memref<32x96xbf16, #tpu.memory_space<vmem>>, vector<32x96xbf16>
    %cst_5 = arith.constant dense<0.000000e+00> : vector<8x96xf32>
    %10 = tpu.matmul %7, %9, %cst_5 {dimension_numbers = #tpu.dot_dimension_numbers<[1], [0], [0], [1], [0, 0, 1, 1], [], []>} : vector<8x32xbf16>, vector<32x96xbf16>, vector<8x96xf32> -> vector<8x96xf32>
    %c0_6 = arith.constant 0 : index
    %c0_7 = arith.constant 0 : index
    %11 = vector.load %arg3[%c0_6, %c0_7] : memref<1x96xf32, #tpu.memory_space<vmem>>, vector<1x96xf32>
    %12 = vector.broadcast %11 : vector<1x96xf32> to vector<8x96xf32>
    %13 = arith.addf %10, %12 : vector<8x96xf32>
    %14 = vector.extract_strided_slice %13 {offsets = [0, 0], sizes = [8, 8], strides = [1, 1]} : vector<8x96xf32> to vector<8x8xf32>
    %15 = vector.extract_strided_slice %13 {offsets = [0, 8], sizes = [8, 8], strides = [1, 1]} : vector<8x96xf32> to vector<8x8xf32>
    %16 = vector.extract_strided_slice %13 {offsets = [0, 16], sizes = [8, 8], strides = [1, 1]} : vector<8x96xf32> to vector<8x8xf32>
    %17 = vector.extract_strided_slice %13 {offsets = [0, 24], sizes = [8, 8], strides = [1, 1]} : vector<8x96xf32> to vector<8x8xf32>
    %18 = vector.shape_cast %14 : vector<8x8xf32> to vector<1x8x8xf32>
    %19 = vector.shape_cast %15 : vector<8x8xf32> to vector<1x8x8xf32>
    %20 = vector.shape_cast %16 : vector<8x8xf32> to vector<1x8x8xf32>
    %21 = vector.shape_cast %17 : vector<8x8xf32> to vector<1x8x8xf32>
    %22 = tpu.concatenate %18, %19, %20, %21 in 0 : vector<1x8x8xf32>, vector<1x8x8xf32>, vector<1x8x8xf32>, vector<1x8x8xf32> -> vector<4x8x8xf32>
    %23 = vector.extract_strided_slice %13 {offsets = [0, 32], sizes = [8, 8], strides = [1, 1]} : vector<8x96xf32> to vector<8x8xf32>
    %24 = vector.extract_strided_slice %13 {offsets = [0, 40], sizes = [8, 8], strides = [1, 1]} : vector<8x96xf32> to vector<8x8xf32>
    %25 = vector.extract_strided_slice %13 {offsets = [0, 48], sizes = [8, 8], strides = [1, 1]} : vector<8x96xf32> to vector<8x8xf32>
    %26 = vector.extract_strided_slice %13 {offsets = [0, 56], sizes = [8, 8], strides = [1, 1]} : vector<8x96xf32> to vector<8x8xf32>
    %27 = vector.shape_cast %23 : vector<8x8xf32> to vector<1x8x8xf32>
    %28 = vector.shape_cast %24 : vector<8x8xf32> to vector<1x8x8xf32>
    %29 = vector.shape_cast %25 : vector<8x8xf32> to vector<1x8x8xf32>
    %30 = vector.shape_cast %26 : vector<8x8xf32> to vector<1x8x8xf32>
    %31 = tpu.concatenate %27, %28, %29, %30 in 0 : vector<1x8x8xf32>, vector<1x8x8xf32>, vector<1x8x8xf32>, vector<1x8x8xf32> -> vector<4x8x8xf32>
    %32 = vector.extract_strided_slice %13 {offsets = [0, 64], sizes = [8, 8], strides = [1, 1]} : vector<8x96xf32> to vector<8x8xf32>
    %33 = vector.extract_strided_slice %13 {offsets = [0, 72], sizes = [8, 8], strides = [1, 1]} : vector<8x96xf32> to vector<8x8xf32>
    %34 = vector.extract_strided_slice %13 {offsets = [0, 80], sizes = [8, 8], strides = [1, 1]} : vector<8x96xf32> to vector<8x8xf32>
    %35 = vector.extract_strided_slice %13 {offsets = [0, 88], sizes = [8, 8], strides = [1, 1]} : vector<8x96xf32> to vector<8x8xf32>
    %36 = vector.shape_cast %32 : vector<8x8xf32> to vector<1x8x8xf32>
    %37 = vector.shape_cast %33 : vector<8x8xf32> to vector<1x8x8xf32>
    %38 = vector.shape_cast %34 : vector<8x8xf32> to vector<1x8x8xf32>
    %39 = vector.shape_cast %35 : vector<8x8xf32> to vector<1x8x8xf32>
    %40 = tpu.concatenate %36, %37, %38, %39 in 0 : vector<1x8x8xf32>, vector<1x8x8xf32>, vector<1x8x8xf32>, vector<1x8x8xf32> -> vector<4x8x8xf32>
    %41 = arith.truncf %22 : vector<4x8x8xf32> to vector<4x8x8xbf16>
    %42 = arith.truncf %31 : vector<4x8x8xf32> to vector<4x8x8xbf16>
    "tpu.trace_start"() <{level = 10 : i32, message = "hqd,hkd->hqk"}> : () -> ()
    %cst_8 = arith.constant dense<0.000000e+00> : vector<4x8x8xf32>
    %43 = tpu.matmul %41, %42, %cst_8 {dimension_numbers = #tpu.dot_dimension_numbers<[2], [2], [1], [1], [0, 0, 0, 1, 1, 1], [0], [0]>} : vector<4x8x8xbf16>, vector<4x8x8xbf16>, vector<4x8x8xf32> -> vector<4x8x8xf32>
    "tpu.trace_stop"() : () -> ()
    %44 = vector.shape_cast %5 : vector<8x8xf32> to vector<1x8x8xf32>
    %45 = vector.broadcast %44 : vector<1x8x8xf32> to vector<4x8x8xf32>
    %46 = arith.addf %43, %45 : vector<4x8x8xf32>
    %cst_9 = arith.constant dense<0xFF800000> : vector<4x8xf32>
    %47 = vector.multi_reduction <maximumf>, %46, %cst_9 [2] : vector<4x8x8xf32> to vector<4x8xf32>
    %48 = vector.shape_cast %47 : vector<4x8xf32> to vector<4x8x1xf32>
    %49 = vector.broadcast %48 : vector<4x8x1xf32> to vector<4x8x8xf32>
    %50 = arith.subf %46, %49 : vector<4x8x8xf32>
    %51 = math.exp %50 : vector<4x8x8xf32>
    %cst_10 = arith.constant dense<0.000000e+00> : vector<4x8xf32>
    %52 = vector.multi_reduction <add>, %51, %cst_10 [2] : vector<4x8x8xf32> to vector<4x8xf32>
    %53 = vector.shape_cast %52 : vector<4x8xf32> to vector<4x8x1xf32>
    %54 = tpu.reciprocal %53 {approx = true} : vector<4x8x1xf32> -> vector<4x8x1xf32>
    %55 = vector.broadcast %54 : vector<4x8x1xf32> to vector<4x8x8xf32>
    %56 = arith.mulf %51, %55 : vector<4x8x8xf32>
    %57 = arith.truncf %56 : vector<4x8x8xf32> to vector<4x8x8xbf16>
    %c0_11 = arith.constant 0 : index
    %c0_12 = arith.constant 0 : index
    %c0_13 = arith.constant 0 : index
    %c0_14 = arith.constant 0 : index
    %58 = vector.load %arg21[%c0_11, %c0_12, %c0_13, %c0_14] : memref<1x4x8x8xbf16, #tpu.memory_space<vmem>>, vector<1x4x8x8xbf16>
    %59 = vector.shape_cast %58 : vector<1x4x8x8xbf16> to vector<4x8x8xbf16>
    %60 = vector.shape_cast %57 : vector<4x8x8xbf16> to vector<1x4x8x8xbf16>
    tpu.vector_store %arg21[%c0_11, %c0_12, %c0_13, %c0_14], %60 {strides = array<i32>} : memref<1x4x8x8xbf16, #tpu.memory_space<vmem>>, vector<1x4x8x8xbf16>,
    %61 = arith.truncf %56 : vector<4x8x8xf32> to vector<4x8x8xbf16>
    %62 = arith.truncf %40 : vector<4x8x8xf32> to vector<4x8x8xbf16>
    "tpu.trace_start"() <{level = 10 : i32, message = "hqk,hkd->hqd"}> : () -> ()
    %cst_15 = arith.constant dense<0.000000e+00> : vector<4x8x8xf32>
    %63 = tpu.matmul %61, %62, %cst_15 {dimension_numbers = #tpu.dot_dimension_numbers<[2], [1], [1], [2], [0, 0, 0, 1, 1, 2], [0], [0]>} : vector<4x8x8xbf16>, vector<4x8x8xbf16>, vector<4x8x8xf32> -> vector<4x8x8xf32>
    "tpu.trace_stop"() : () -> ()
    %64 = vector.extract_strided_slice %63 {offsets = [0, 0, 0], sizes = [1, 8, 8], strides = [1, 1, 1]} : vector<4x8x8xf32> to vector<1x8x8xf32>
    %65 = vector.shape_cast %64 : vector<1x8x8xf32> to vector<8x8xf32>
    %66 = vector.extract_strided_slice %63 {offsets = [1, 0, 0], sizes = [1, 8, 8], strides = [1, 1, 1]} : vector<4x8x8xf32> to vector<1x8x8xf32>
    %67 = vector.shape_cast %66 : vector<1x8x8xf32> to vector<8x8xf32>
    %68 = vector.extract_strided_slice %63 {offsets = [2, 0, 0], sizes = [1, 8, 8], strides = [1, 1, 1]} : vector<4x8x8xf32> to vector<1x8x8xf32>
    %69 = vector.shape_cast %68 : vector<1x8x8xf32> to vector<8x8xf32>
    %70 = vector.extract_strided_slice %63 {offsets = [3, 0, 0], sizes = [1, 8, 8], strides = [1, 1, 1]} : vector<4x8x8xf32> to vector<1x8x8xf32>
    %71 = vector.shape_cast %70 : vector<1x8x8xf32> to vector<8x8xf32>
    %72 = tpu.concatenate %65, %67, %69, %71 in 1 : vector<8x8xf32>, vector<8x8xf32>, vector<8x8xf32>, vector<8x8xf32> -> vector<8x32xf32>
    %73 = arith.truncf %72 : vector<8x32xf32> to vector<8x32xbf16>
    %c0_16 = arith.constant 0 : index
    %c0_17 = arith.constant 0 : index
    %74 = vector.load %arg4[%c0_16, %c0_17] : memref<32x32xbf16, #tpu.memory_space<vmem>>, vector<32x32xbf16>
    %cst_18 = arith.constant dense<0.000000e+00> : vector<8x32xf32>
    %75 = tpu.matmul %73, %74, %cst_18 {dimension_numbers = #tpu.dot_dimension_numbers<[1], [0], [0], [1], [0, 0, 1, 1], [], []>} : vector<8x32xbf16>, vector<32x32xbf16>, vector<8x32xf32> -> vector<8x32xf32>
    %c0_19 = arith.constant 0 : index
    %c0_20 = arith.constant 0 : index
    %76 = vector.load %arg5[%c0_19, %c0_20] : memref<1x32xf32, #tpu.memory_space<vmem>>, vector<1x32xf32>
    %77 = vector.broadcast %76 : vector<1x32xf32> to vector<8x32xf32>
    %78 = arith.addf %75, %77 : vector<8x32xf32>
    %79 = arith.addf %78, %8 : vector<8x32xf32>
    %c0_21 = arith.constant 0 : index
    %c0_22 = arith.constant 0 : index
    %80 = vector.load %arg6[%c0_21, %c0_22] : memref<1x32xf32, #tpu.memory_space<vmem>>, vector<1x32xf32>
    %c0_23 = arith.constant 0 : index
    %c0_24 = arith.constant 0 : index
    %81 = vector.load %arg7[%c0_23, %c0_24] : memref<1x32xf32, #tpu.memory_space<vmem>>, vector<1x32xf32>
    %cst_25 = arith.constant dense<0.000000e+00> : vector<8xf32>
    %82 = vector.multi_reduction <add>, %79, %cst_25 [1] : vector<8x32xf32> to vector<8xf32>
    %83 = vector.shape_cast %82 : vector<8xf32> to vector<8x1xf32>
    %cst_26 = arith.constant 3.200000e+01 : f32
    %84 = vector.broadcast %cst_26 : f32 to vector<8x1xf32>
    %85 = arith.divf %83, %84 : vector<8x1xf32>
    %86 = vector.broadcast %85 : vector<8x1xf32> to vector<8x32xf32>
    %87 = arith.subf %79, %86 : vector<8x32xf32>
    %88 = arith.mulf %87, %87 : vector<8x32xf32>
    %cst_27 = arith.constant dense<0.000000e+00> : vector<8xf32>
    %89 = vector.multi_reduction <add>, %88, %cst_27 [1] : vector<8x32xf32> to vector<8xf32>
    %90 = vector.shape_cast %89 : vector<8xf32> to vector<8x1xf32>
    %cst_28 = arith.constant 3.200000e+01 : f32
    %91 = vector.broadcast %cst_28 : f32 to vector<8x1xf32>
    %92 = arith.divf %90, %91 : vector<8x1xf32>
    %cst_29 = arith.constant 9.99999974E-6 : f32
    %93 = vector.broadcast %cst_29 : f32 to vector<8x1xf32>
    %94 = arith.addf %92, %93 : vector<8x1xf32>
    %95 = math.rsqrt %94 : vector<8x1xf32>
    %96 = vector.broadcast %95 : vector<8x1xf32> to vector<8x32xf32>
    %97 = arith.mulf %87, %96 : vector<8x32xf32>
    %98 = vector.broadcast %80 : vector<1x32xf32> to vector<8x32xf32>
    %99 = arith.mulf %97, %98 : vector<8x32xf32>
    %100 = vector.broadcast %81 : vector<1x32xf32> to vector<8x32xf32>
    %101 = arith.addf %99, %100 : vector<8x32xf32>
    %102 = arith.truncf %101 : vector<8x32xf32> to vector<8x32xbf16>
    %c0_30 = arith.constant 0 : index
    %c0_31 = arith.constant 0 : index
    %103 = vector.load %arg8[%c0_30, %c0_31] : memref<32x96xbf16, #tpu.memory_space<vmem>>, vector<32x96xbf16>
    %cst_32 = arith.constant dense<0.000000e+00> : vector<8x96xf32>
    %104 = tpu.matmul %102, %103, %cst_32 {dimension_numbers = #tpu.dot_dimension_numbers<[1], [0], [0], [1], [0, 0, 1, 1], [], []>} : vector<8x32xbf16>, vector<32x96xbf16>, vector<8x96xf32> -> vector<8x96xf32>
    %c0_33 = arith.constant 0 : index
    %c0_34 = arith.constant 0 : index
    %105 = vector.load %arg9[%c0_33, %c0_34] : memref<1x96xf32, #tpu.memory_space<vmem>>, vector<1x96xf32>
    %106 = vector.broadcast %105 : vector<1x96xf32> to vector<8x96xf32>
    %107 = arith.addf %104, %106 : vector<8x96xf32>
    %108 = vector.extract_strided_slice %107 {offsets = [0, 0], sizes = [8, 8], strides = [1, 1]} : vector<8x96xf32> to vector<8x8xf32>
    %109 = vector.extract_strided_slice %107 {offsets = [0, 8], sizes = [8, 8], strides = [1, 1]} : vector<8x96xf32> to vector<8x8xf32>
    %110 = vector.extract_strided_slice %107 {offsets = [0, 16], sizes = [8, 8], strides = [1, 1]} : vector<8x96xf32> to vector<8x8xf32>
    %111 = vector.extract_strided_slice %107 {offsets = [0, 24], sizes = [8, 8], strides = [1, 1]} : vector<8x96xf32> to vector<8x8xf32>
    %112 = vector.shape_cast %108 : vector<8x8xf32> to vector<1x8x8xf32>
    %113 = vector.shape_cast %109 : vector<8x8xf32> to vector<1x8x8xf32>
    %114 = vector.shape_cast %110 : vector<8x8xf32> to vector<1x8x8xf32>
    %115 = vector.shape_cast %111 : vector<8x8xf32> to vector<1x8x8xf32>
    %116 = tpu.concatenate %112, %113, %114, %115 in 0 : vector<1x8x8xf32>, vector<1x8x8xf32>, vector<1x8x8xf32>, vector<1x8x8xf32> -> vector<4x8x8xf32>
    %117 = vector.extract_strided_slice %107 {offsets = [0, 32], sizes = [8, 8], strides = [1, 1]} : vector<8x96xf32> to vector<8x8xf32>
    %118 = vector.extract_strided_slice %107 {offsets = [0, 40], sizes = [8, 8], strides = [1, 1]} : vector<8x96xf32> to vector<8x8xf32>
    %119 = vector.extract_strided_slice %107 {offsets = [0, 48], sizes = [8, 8], strides = [1, 1]} : vector<8x96xf32> to vector<8x8xf32>
    %120 = vector.extract_strided_slice %107 {offsets = [0, 56], sizes = [8, 8], strides = [1, 1]} : vector<8x96xf32> to vector<8x8xf32>
    %121 = vector.shape_cast %117 : vector<8x8xf32> to vector<1x8x8xf32>
    %122 = vector.shape_cast %118 : vector<8x8xf32> to vector<1x8x8xf32>
    %123 = vector.shape_cast %119 : vector<8x8xf32> to vector<1x8x8xf32>
    %124 = vector.shape_cast %120 : vector<8x8xf32> to vector<1x8x8xf32>
    %125 = tpu.concatenate %121, %122, %123, %124 in 0 : vector<1x8x8xf32>, vector<1x8x8xf32>, vector<1x8x8xf32>, vector<1x8x8xf32> -> vector<4x8x8xf32>
    %126 = vector.extract_strided_slice %107 {offsets = [0, 64], sizes = [8, 8], strides = [1, 1]} : vector<8x96xf32> to vector<8x8xf32>
    %127 = vector.extract_strided_slice %107 {offsets = [0, 72], sizes = [8, 8], strides = [1, 1]} : vector<8x96xf32> to vector<8x8xf32>
    %128 = vector.extract_strided_slice %107 {offsets = [0, 80], sizes = [8, 8], strides = [1, 1]} : vector<8x96xf32> to vector<8x8xf32>
    %129 = vector.extract_strided_slice %107 {offsets = [0, 88], sizes = [8, 8], strides = [1, 1]} : vector<8x96xf32> to vector<8x8xf32>
    %130 = vector.shape_cast %126 : vector<8x8xf32> to vector<1x8x8xf32>
    %131 = vector.shape_cast %127 : vector<8x8xf32> to vector<1x8x8xf32>
    %132 = vector.shape_cast %128 : vector<8x8xf32> to vector<1x8x8xf32>
    %133 = vector.shape_cast %129 : vector<8x8xf32> to vector<1x8x8xf32>
    %134 = tpu.concatenate %130, %131, %132, %133 in 0 : vector<1x8x8xf32>, vector<1x8x8xf32>, vector<1x8x8xf32>, vector<1x8x8xf32> -> vector<4x8x8xf32>
    %135 = arith.truncf %116 : vector<4x8x8xf32> to vector<4x8x8xbf16>
    %136 = arith.truncf %125 : vector<4x8x8xf32> to vector<4x8x8xbf16>
    "tpu.trace_start"() <{level = 10 : i32, message = "hqd,hkd->hqk"}> : () -> ()
    %cst_35 = arith.constant dense<0.000000e+00> : vector<4x8x8xf32>
    %137 = tpu.matmul %135, %136, %cst_35 {dimension_numbers = #tpu.dot_dimension_numbers<[2], [2], [1], [1], [0, 0, 0, 1, 1, 1], [0], [0]>} : vector<4x8x8xbf16>, vector<4x8x8xbf16>, vector<4x8x8xf32> -> vector<4x8x8xf32>
    "tpu.trace_stop"() : () -> ()
    %cst_36 = arith.constant dense<0xFF800000> : vector<4x8xf32>
    %138 = vector.multi_reduction <maximumf>, %137, %cst_36 [2] : vector<4x8x8xf32> to vector<4x8xf32>
    %139 = vector.shape_cast %138 : vector<4x8xf32> to vector<4x8x1xf32>
    %140 = vector.broadcast %139 : vector<4x8x1xf32> to vector<4x8x8xf32>
    %141 = arith.subf %137, %140 : vector<4x8x8xf32>
    %142 = math.exp %141 : vector<4x8x8xf32>
    %cst_37 = arith.constant dense<0.000000e+00> : vector<4x8xf32>
    %143 = vector.multi_reduction <add>, %142, %cst_37 [2] : vector<4x8x8xf32> to vector<4x8xf32>
    %144 = vector.shape_cast %143 : vector<4x8xf32> to vector<4x8x1xf32>
    %145 = tpu.reciprocal %144 {approx = true} : vector<4x8x1xf32> -> vector<4x8x1xf32>
    %146 = vector.broadcast %145 : vector<4x8x1xf32> to vector<4x8x8xf32>
    %147 = arith.mulf %142, %146 : vector<4x8x8xf32>
    %148 = arith.truncf %147 : vector<4x8x8xf32> to vector<4x8x8xbf16>
    %c0_38 = arith.constant 0 : index
    %c0_39 = arith.constant 0 : index
    %c0_40 = arith.constant 0 : index
    %c0_41 = arith.constant 0 : index
    %149 = vector.load %arg22[%c0_38, %c0_39, %c0_40, %c0_41] : memref<1x4x8x8xbf16, #tpu.memory_space<vmem>>, vector<1x4x8x8xbf16>
    %150 = vector.shape_cast %149 : vector<1x4x8x8xbf16> to vector<4x8x8xbf16>
    %151 = vector.shape_cast %148 : vector<4x8x8xbf16> to vector<1x4x8x8xbf16>
    tpu.vector_store %arg22[%c0_38, %c0_39, %c0_40, %c0_41], %151 {strides = array<i32>} : memref<1x4x8x8xbf16, #tpu.memory_space<vmem>>, vector<1x4x8x8xbf16>,
    %152 = arith.truncf %147 : vector<4x8x8xf32> to vector<4x8x8xbf16>
    %153 = arith.truncf %134 : vector<4x8x8xf32> to vector<4x8x8xbf16>
    "tpu.trace_start"() <{level = 10 : i32, message = "hqk,hkd->hqd"}> : () -> ()
    %cst_42 = arith.constant dense<0.000000e+00> : vector<4x8x8xf32>
    %154 = tpu.matmul %152, %153, %cst_42 {dimension_numbers = #tpu.dot_dimension_numbers<[2], [1], [1], [2], [0, 0, 0, 1, 1, 2], [0], [0]>} : vector<4x8x8xbf16>, vector<4x8x8xbf16>, vector<4x8x8xf32> -> vector<4x8x8xf32>
    "tpu.trace_stop"() : () -> ()
    %155 = vector.extract_strided_slice %154 {offsets = [0, 0, 0], sizes = [1, 8, 8], strides = [1, 1, 1]} : vector<4x8x8xf32> to vector<1x8x8xf32>
    %156 = vector.shape_cast %155 : vector<1x8x8xf32> to vector<8x8xf32>
    %157 = vector.extract_strided_slice %154 {offsets = [1, 0, 0], sizes = [1, 8, 8], strides = [1, 1, 1]} : vector<4x8x8xf32> to vector<1x8x8xf32>
    %158 = vector.shape_cast %157 : vector<1x8x8xf32> to vector<8x8xf32>
    %159 = vector.extract_strided_slice %154 {offsets = [2, 0, 0], sizes = [1, 8, 8], strides = [1, 1, 1]} : vector<4x8x8xf32> to vector<1x8x8xf32>
    %160 = vector.shape_cast %159 : vector<1x8x8xf32> to vector<8x8xf32>
    %161 = vector.extract_strided_slice %154 {offsets = [3, 0, 0], sizes = [1, 8, 8], strides = [1, 1, 1]} : vector<4x8x8xf32> to vector<1x8x8xf32>
    %162 = vector.shape_cast %161 : vector<1x8x8xf32> to vector<8x8xf32>
    %163 = tpu.concatenate %156, %158, %160, %162 in 1 : vector<8x8xf32>, vector<8x8xf32>, vector<8x8xf32>, vector<8x8xf32> -> vector<8x32xf32>
    %164 = arith.truncf %163 : vector<8x32xf32> to vector<8x32xbf16>
    %c0_43 = arith.constant 0 : index
    %c0_44 = arith.constant 0 : index
    %165 = vector.load %arg10[%c0_43, %c0_44] : memref<32x32xbf16, #tpu.memory_space<vmem>>, vector<32x32xbf16>
    %cst_45 = arith.constant dense<0.000000e+00> : vector<8x32xf32>
    %166 = tpu.matmul %164, %165, %cst_45 {dimension_numbers = #tpu.dot_dimension_numbers<[1], [0], [0], [1], [0, 0, 1, 1], [], []>} : vector<8x32xbf16>, vector<32x32xbf16>, vector<8x32xf32> -> vector<8x32xf32>
    %c0_46 = arith.constant 0 : index
    %c0_47 = arith.constant 0 : index
    %167 = vector.load %arg11[%c0_46, %c0_47] : memref<1x32xf32, #tpu.memory_space<vmem>>, vector<1x32xf32>
    %168 = vector.broadcast %167 : vector<1x32xf32> to vector<8x32xf32>
    %169 = arith.addf %166, %168 : vector<8x32xf32>
    %170 = arith.addf %169, %101 : vector<8x32xf32>
    %c0_48 = arith.constant 0 : index
    %c0_49 = arith.constant 0 : index
    %171 = vector.load %arg12[%c0_48, %c0_49] : memref<1x32xf32, #tpu.memory_space<vmem>>, vector<1x32xf32>
    %c0_50 = arith.constant 0 : index
    %c0_51 = arith.constant 0 : index
    %172 = vector.load %arg13[%c0_50, %c0_51] : memref<1x32xf32, #tpu.memory_space<vmem>>, vector<1x32xf32>
    %cst_52 = arith.constant dense<0.000000e+00> : vector<8xf32>
    %173 = vector.multi_reduction <add>, %170, %cst_52 [1] : vector<8x32xf32> to vector<8xf32>
    %174 = vector.shape_cast %173 : vector<8xf32> to vector<8x1xf32>
    %cst_53 = arith.constant 3.200000e+01 : f32
    %175 = vector.broadcast %cst_53 : f32 to vector<8x1xf32>
    %176 = arith.divf %174, %175 : vector<8x1xf32>
    %177 = vector.broadcast %176 : vector<8x1xf32> to vector<8x32xf32>
    %178 = arith.subf %170, %177 : vector<8x32xf32>
    %179 = arith.mulf %178, %178 : vector<8x32xf32>
    %cst_54 = arith.constant dense<0.000000e+00> : vector<8xf32>
    %180 = vector.multi_reduction <add>, %179, %cst_54 [1] : vector<8x32xf32> to vector<8xf32>
    %181 = vector.shape_cast %180 : vector<8xf32> to vector<8x1xf32>
    %cst_55 = arith.constant 3.200000e+01 : f32
    %182 = vector.broadcast %cst_55 : f32 to vector<8x1xf32>
    %183 = arith.divf %181, %182 : vector<8x1xf32>
    %cst_56 = arith.constant 9.99999974E-6 : f32
    %184 = vector.broadcast %cst_56 : f32 to vector<8x1xf32>
    %185 = arith.addf %183, %184 : vector<8x1xf32>
    %186 = math.rsqrt %185 : vector<8x1xf32>
    %187 = vector.broadcast %186 : vector<8x1xf32> to vector<8x32xf32>
    %188 = arith.mulf %178, %187 : vector<8x32xf32>
    %189 = vector.broadcast %171 : vector<1x32xf32> to vector<8x32xf32>
    %190 = arith.mulf %188, %189 : vector<8x32xf32>
    %191 = vector.broadcast %172 : vector<1x32xf32> to vector<8x32xf32>
    %192 = arith.addf %190, %191 : vector<8x32xf32>
    %193 = arith.truncf %192 : vector<8x32xf32> to vector<8x32xbf16>
    %c0_57 = arith.constant 0 : index
    %c0_58 = arith.constant 0 : index
    %194 = vector.load %arg14[%c0_57, %c0_58] : memref<32x64xbf16, #tpu.memory_space<vmem>>, vector<32x64xbf16>
    %cst_59 = arith.constant dense<0.000000e+00> : vector<8x64xf32>
    %195 = tpu.matmul %193, %194, %cst_59 {dimension_numbers = #tpu.dot_dimension_numbers<[1], [0], [0], [1], [0, 0, 1, 1], [], []>} : vector<8x32xbf16>, vector<32x64xbf16>, vector<8x64xf32> -> vector<8x64xf32>
    %c0_60 = arith.constant 0 : index
    %c0_61 = arith.constant 0 : index
    %196 = vector.load %arg15[%c0_60, %c0_61] : memref<1x64xf32, #tpu.memory_space<vmem>>, vector<1x64xf32>
    %197 = vector.broadcast %196 : vector<1x64xf32> to vector<8x64xf32>
    %198 = arith.addf %195, %197 : vector<8x64xf32>
    %cst_62 = arith.constant 0.000000e+00 : f32
    %199 = vector.broadcast %cst_62 : f32 to vector<8x64xf32>
    %200 = arith.maximumf %198, %199 : vector<8x64xf32>
    %201 = arith.truncf %200 : vector<8x64xf32> to vector<8x64xbf16>
    %c0_63 = arith.constant 0 : index
    %c0_64 = arith.constant 0 : index
    %202 = vector.load %arg16[%c0_63, %c0_64] : memref<64x32xbf16, #tpu.memory_space<vmem>>, vector<64x32xbf16>
    %cst_65 = arith.constant dense<0.000000e+00> : vector<8x32xf32>
    %203 = tpu.matmul %201, %202, %cst_65 {dimension_numbers = #tpu.dot_dimension_numbers<[1], [0], [0], [1], [0, 0, 1, 1], [], []>} : vector<8x64xbf16>, vector<64x32xbf16>, vector<8x32xf32> -> vector<8x32xf32>
    %c0_66 = arith.constant 0 : index
    %c0_67 = arith.constant 0 : index
    %204 = vector.load %arg17[%c0_66, %c0_67] : memref<1x32xf32, #tpu.memory_space<vmem>>, vector<1x32xf32>
    %205 = vector.broadcast %204 : vector<1x32xf32> to vector<8x32xf32>
    %206 = arith.addf %203, %205 : vector<8x32xf32>
    %207 = arith.addf %206, %192 : vector<8x32xf32>
    %c0_68 = arith.constant 0 : index
    %c0_69 = arith.constant 0 : index
    %208 = vector.load %arg18[%c0_68, %c0_69] : memref<1x32xf32, #tpu.memory_space<vmem>>, vector<1x32xf32>
    %c0_70 = arith.constant 0 : index
    %c0_71 = arith.constant 0 : index
    %209 = vector.load %arg19[%c0_70, %c0_71] : memref<1x32xf32, #tpu.memory_space<vmem>>, vector<1x32xf32>
    %cst_72 = arith.constant dense<0.000000e+00> : vector<8xf32>
    %210 = vector.multi_reduction <add>, %207, %cst_72 [1] : vector<8x32xf32> to vector<8xf32>
    %211 = vector.shape_cast %210 : vector<8xf32> to vector<8x1xf32>
    %cst_73 = arith.constant 3.200000e+01 : f32
    %212 = vector.broadcast %cst_73 : f32 to vector<8x1xf32>
    %213 = arith.divf %211, %212 : vector<8x1xf32>
    %214 = vector.broadcast %213 : vector<8x1xf32> to vector<8x32xf32>
    %215 = arith.subf %207, %214 : vector<8x32xf32>
    %216 = arith.mulf %215, %215 : vector<8x32xf32>
    %cst_74 = arith.constant dense<0.000000e+00> : vector<8xf32>
    %217 = vector.multi_reduction <add>, %216, %cst_74 [1] : vector<8x32xf32> to vector<8xf32>
    %218 = vector.shape_cast %217 : vector<8xf32> to vector<8x1xf32>
    %cst_75 = arith.constant 3.200000e+01 : f32
    %219 = vector.broadcast %cst_75 : f32 to vector<8x1xf32>
    %220 = arith.divf %218, %219 : vector<8x1xf32>
    %cst_76 = arith.constant 9.99999974E-6 : f32
    %221 = vector.broadcast %cst_76 : f32 to vector<8x1xf32>
    %222 = arith.addf %220, %221 : vector<8x1xf32>
    %223 = math.rsqrt %222 : vector<8x1xf32>
    %224 = vector.broadcast %223 : vector<8x1xf32> to vector<8x32xf32>
    %225 = arith.mulf %215, %224 : vector<8x32xf32>
    %226 = vector.broadcast %208 : vector<1x32xf32> to vector<8x32xf32>
    %227 = arith.mulf %225, %226 : vector<8x32xf32>
    %228 = vector.broadcast %209 : vector<1x32xf32> to vector<8x32xf32>
    %229 = arith.addf %227, %228 : vector<8x32xf32>
    %c0_77 = arith.constant 0 : index
    %c0_78 = arith.constant 0 : index
    %c0_79 = arith.constant 0 : index
    %230 = vector.load %arg20[%c0_77, %c0_78, %c0_79] : memref<1x8x32xf32, #tpu.memory_space<vmem>>, vector<1x8x32xf32>
    %231 = vector.shape_cast %230 : vector<1x8x32xf32> to vector<8x32xf32>
    %232 = vector.shape_cast %229 : vector<8x32xf32> to vector<1x8x32xf32>
    tpu.vector_store %arg20[%c0_77, %c0_78, %c0_79], %232 {strides = array<i32>} : memref<1x8x32xf32, #tpu.memory_space<vmem>>, vector<1x8x32xf32>,
    return
  }
  func.func @transform_0(%arg0: i32) -> (i32, i32, i32) {
    %c0_i32 = arith.constant 0 : i32
    %c0_i32_0 = arith.constant 0 : i32
    %c0_i32_1 = arith.constant 0 : i32
    return %arg0, %c0_i32, %c0_i32_0 : i32, i32, i32
  }
  func.func @transform_1(%arg0: i32) -> (i32, i32) {
    %c0_i32 = arith.constant 0 : i32
    %c0_i32_0 = arith.constant 0 : i32
    %c0_i32_1 = arith.constant 0 : i32
    return %c0_i32, %c0_i32_0 : i32, i32
  }
  func.func @transform_2(%arg0: i32) -> (i32, i32) {
    %c0_i32 = arith.constant 0 : i32
    %c0_i32_0 = arith.constant 0 : i32
    %c0_i32_1 = arith.constant 0 : i32
    return %c0_i32, %c0_i32_0 : i32, i32
  }
  func.func @transform_3(%arg0: i32) -> (i32, i32) {
    %c0_i32 = arith.constant 0 : i32
    %c0_i32_0 = arith.constant 0 : i32
    %c0_i32_1 = arith.constant 0 : i32
    return %c0_i32, %c0_i32_0 : i32, i32
  }
  func.func @transform_4(%arg0: i32) -> (i32, i32) {
    %c0_i32 = arith.constant 0 : i32
    %c0_i32_0 = arith.constant 0 : i32
    %c0_i32_1 = arith.constant 0 : i32
    return %c0_i32, %c0_i32_0 : i32, i32
  }
  func.func @transform_5(%arg0: i32) -> (i32, i32) {
    %c0_i32 = arith.constant 0 : i32
    %c0_i32_0 = arith.constant 0 : i32
    %c0_i32_1 = arith.constant 0 : i32
    return %c0_i32, %c0_i32_0 : i32, i32
  }
  func.func @transform_6(%arg0: i32) -> (i32, i32) {
    %c0_i32 = arith.constant 0 : i32
    %c0_i32_0 = arith.constant 0 : i32
    %c0_i32_1 = arith.constant 0 : i32
    return %c0_i32, %c0_i32_0 : i32, i32
  }
  func.func @transform_7(%arg0: i32) -> (i32, i32) {
    %c0_i32 = arith.constant 0 : i32
    %c0_i32_0 = arith.constant 0 : i32
    %c0_i32_1 = arith.constant 0 : i32
    return %c0_i32, %c0_i32_0 : i32, i32
  }
  func.func @transform_8(%arg0: i32) -> (i32, i32) {
    %c0_i32 = arith.constant 0 : i32
    %c0_i32_0 = arith.constant 0 : i32
    %c0_i32_1 = arith.constant 0 : i32
    return %c0_i32, %c0_i32_0 : i32, i32
  }
  func.func @transform_9(%arg0: i32) -> (i32, i32) {
    %c0_i32 = arith.constant 0 : i32
    %c0_i32_0 = arith.constant 0 : i32
    %c0_i32_1 = arith.constant 0 : i32
    return %c0_i32, %c0_i32_0 : i32, i32
  }
  func.func @transform_10(%arg0: i32) -> (i32, i32) {
    %c0_i32 = arith.constant 0 : i32
    %c0_i32_0 = arith.constant 0 : i32
    %c0_i32_1 = arith.constant 0 : i32
    return %c0_i32, %c0_i32_0 : i32, i32
  }
  func.func @transform_11(%arg0: i32) -> (i32, i32) {
    %c0_i32 = arith.constant 0 : i32
    %c0_i32_0 = arith.constant 0 : i32
    %c0_i32_1 = arith.constant 0 : i32
    return %c0_i32, %c0_i32_0 : i32, i32
  }
  func.func @transform_12(%arg0: i32) -> (i32, i32) {
    %c0_i32 = arith.constant 0 : i32
    %c0_i32_0 = arith.constant 0 : i32
    %c0_i32_1 = arith.constant 0 : i32
    return %c0_i32, %c0_i32_0 : i32, i32
  }
  func.func @transform_13(%arg0: i32) -> (i32, i32) {
    %c0_i32 = arith.constant 0 : i32
    %c0_i32_0 = arith.constant 0 : i32
    %c0_i32_1 = arith.constant 0 : i32
    return %c0_i32, %c0_i32_0 : i32, i32
  }
  func.func @transform_14(%arg0: i32) -> (i32, i32) {
    %c0_i32 = arith.constant 0 : i32
    %c0_i32_0 = arith.constant 0 : i32
    %c0_i32_1 = arith.constant 0 : i32
    return %c0_i32, %c0_i32_0 : i32, i32
  }
  func.func @transform_15(%arg0: i32) -> (i32, i32) {
    %c0_i32 = arith.constant 0 : i32
    %c0_i32_0 = arith.constant 0 : i32
    %c0_i32_1 = arith.constant 0 : i32
    return %c0_i32, %c0_i32_0 : i32, i32
  }
  func.func @transform_16(%arg0: i32) -> (i32, i32) {
    %c0_i32 = arith.constant 0 : i32
    %c0_i32_0 = arith.constant 0 : i32
    %c0_i32_1 = arith.constant 0 : i32
    return %c0_i32, %c0_i32_0 : i32, i32
  }
  func.func @transform_17(%arg0: i32) -> (i32, i32) {
    %c0_i32 = arith.constant 0 : i32
    %c0_i32_0 = arith.constant 0 : i32
    %c0_i32_1 = arith.constant 0 : i32
    return %c0_i32, %c0_i32_0 : i32, i32
  }
  func.func @transform_18(%arg0: i32) -> (i32, i32) {
    %c0_i32 = arith.constant 0 : i32
    %c0_i32_0 = arith.constant 0 : i32
    %c0_i32_1 = arith.constant 0 : i32
    return %c0_i32, %c0_i32_0 : i32, i32
  }
  func.func @transform_19(%arg0: i32) -> (i32, i32, i32) {
    %c0_i32 = arith.constant 0 : i32
    %c0_i32_0 = arith.constant 0 : i32
    %c0_i32_1 = arith.constant 0 : i32
    return %arg0, %c0_i32, %c0_i32_0 : i32, i32, i32
  }
  func.func @transform_20(%arg0: i32) -> (i32, i32, i32, i32) {
    %c0_i32 = arith.constant 0 : i32
    %c0_i32_0 = arith.constant 0 : i32
    %c0_i32_1 = arith.constant 0 : i32
    %c0_i32_2 = arith.constant 0 : i32
    return %arg0, %c0_i32, %c0_i32_0, %c0_i32_1 : i32, i32, i32, i32
  }
  func.func @transform_21(%arg0: i32) -> (i32, i32, i32, i32) {
    %c0_i32 = arith.constant 0 : i32
    %c0_i32_0 = arith.constant 0 : i32
    %c0_i32_1 = arith.constant 0 : i32
    %c0_i32_2 = arith.constant 0 : i32
    return %arg0, %c0_i32, %c0_i32_0, %c0_i32_1 : i32, i32, i32, i32
  }
}

</mosaic_0001>

<bundles_post_ra>
// kernel: tpu_custom_call.1
= control target key start
LH: loop header
LB: loop body
LE: loop exit
PB: predicated region body
PF: predicated region fallthrough
CT: control target
= control target key end

     0   :  { %s3681_s0 = inlined_call_operand.hbm [shape: bf16[2,8,32], index: 0, kind: input, shape index: {}]   ;;  %s3682_s1 = inlined_call_operand.vmem [shape: bf16[32,96], index: 1, kind: input, shape index: {}]   ;;  %s3683_s2 = inlined_call_operand.vmem [shape: f32[1,96], index: 2, kind: input, shape index: {}]   ;;  %s3684_s3 = inlined_call_operand.vmem [shape: bf16[32,32], index: 3, kind: input, shape index: {}]   ;;  %s3685_s4 = inlined_call_operand.vmem [shape: f32[1,32], index: 4, kind: input, shape index: {}]   ;;  %s3686_s5 = inlined_call_operand.vmem [shape: f32[1,32], index: 5, kind: input, shape index: {}]   ;;  %s3687_s6 = inlined_call_operand.vmem [shape: f32[1,32], index: 6, kind: input, shape index: {}]   ;;  %s3688_s7 = inlined_call_operand.vmem [shape: bf16[32,96], index: 7, kind: input, shape index: {}]   ;;  %s3689_s8 = inlined_call_operand.vmem [shape: f32[1,96], index: 8, kind: input, shape index: {}]   ;;  %s3690_s9 = inlined_call_operand.hbm [shape: bf16[32,32], index: 9, kind: input, shape index: {}]   ;;  %s3691_s10 = inlined_call_operand.vmem [shape: f32[1,32], index: 10, kind: input, shape index: {}]   ;;  %s3692_s11 = inlined_call_operand.vmem [shape: f32[1,32], index: 11, kind: input, shape index: {}]   ;;  %s3693_s12 = inlined_call_operand.vmem [shape: f32[1,32], index: 12, kind: input, shape index: {}]   ;;  %s3694_s13 = inlined_call_operand.hbm [shape: bf16[32,64], index: 13, kind: input, shape index: {}]   ;;  %s3695_s14 = inlined_call_operand.vmem [shape: f32[1,64], index: 14, kind: input, shape index: {}]   ;;  %s3696_s15 = inlined_call_operand.vmem [shape: bf16[64,32], index: 15, kind: input, shape index: {}]   ;;  %s3697_s16 = inlined_call_operand.vmem [shape: f32[1,32], index: 16, kind: input, shape index: {}]   ;;  %s3698_s17 = inlined_call_operand.vmem [shape: f32[1,32], index: 17, kind: input, shape index: {}]   ;;  %s3699_s18 = inlined_call_operand.vmem [shape: f32[1,32], index: 18, kind: input, shape index: {}]   ;;  %s3700_s19 = inlined_call_operand.hbm [shape: f32[2,8,32], index: 19, kind: output, shape index: {0}]   ;;  %s3701_s20 = inlined_call_operand.hbm [shape: bf16[2,4,8,8], index: 20, kind: output, shape index: {1}]   ;;  %s3702_s21 = inlined_call_operand.hbm [shape: bf16[2,4,8,8], index: 21, kind: output, shape index: {2}]  }
   0x1   :  { %3726 = sst [smem:[#allocation22_spill]] %s3681_s0 }
   0x2   :  { %3727 = sst [smem:[#allocation23_spill]] %s3682_s1 }
   0x3   :  { %3728 = sst [smem:[#allocation24_spill]] %s3683_s2 }
   0x4   :  { %3729 = sst [smem:[#allocation25_spill]] %s3684_s3 }
   0x5   :  { %3730 = sst [smem:[#allocation26_spill]] %s3685_s4 }
   0x6   :  { %3731 = sst [smem:[#allocation27_spill]] %s3686_s5 }
   0x7   :  { %3732 = sst [smem:[#allocation28_spill]] %s3687_s6 }
   0x8   :  { %3733 = sst [smem:[#allocation29_spill]] %s3688_s7 }
   0x9   :  { %3734 = sst [smem:[#allocation30_spill]] %s3690_s9 }
   0xa   :  { %3735 = sst [smem:[#allocation31_spill]] %s3694_s13 }
   0xb   :  { %3736 = sst [smem:[#allocation32_spill]] %s3698_s17 }
   0xc   :  { %3737 = sst [smem:[#allocation33_spill]] %s3699_s18 }
   0xd   :  { %3738 = sst [smem:[#allocation34_spill]] %s3700_s19 }
   0xe   :  { %27 = vsyncpa [#allocation3], 0 }
   0xf   :  { %29 = vsyncpa [#allocation3 + $0x1], 0 }
  0x10   :  { %30 = vsyncpa [#allocation6], 0 }
  0x11   :  { %31 = vsyncpa [#allocation4], 0 }
  0x12   :  { %33 = vsyncpa [#allocation4 + $0x1], 0 }
  0x13   :  { %34 = vsyncpa [#allocation10], 0 }
  0x14   :  { %36 = vsyncpa [#allocation10 + $0x1], 0  ;;  %s3142_s2 = smov 0   ;;  %s3144_s25 = smov 0  }
  0x15   :  { %s3146_s26 = smov 0   ;;  %s3148_s27 = smov 0  }
  0x16 LB: > { %3739 = sst [smem:[#allocation16_spill]] %s2998_s2  ;;  %s3163_s3 = sadd.s32 4294967295, %s3010_s27   ;;  %s3010_s27 = sphi %s3148_s27, %s3782_s27   ;;  %s3006_s26 = sphi %s3146_s26, %s3784_s26   ;;  %s3002_s25 = sphi %s3144_s25, %s3786_s25   ;;  %s2998_s2 = sphi %s3142_s2, %s3785_s2  }
  0x17   : > { %3740 = sst [smem:[#allocation17_spill]] %s3006_s26  ;;  %s3706_s28 = sadd.s32 4294967294, %s3010_s27  }
  0x18   : > { %3741 = sst [smem:[#allocation18_spill]] %s3010_s27  ;;  %p62_p0 = scmp.ne.s32.totalorder %s3002_s25, %s2998_s2 }
  0x19   : > { %p3709_p1 = scmp.eq.s32.totalorder %s3163_s3, 0  ;;  %p470_p3 = scmp.eq.s32.totalorder %s3706_s28, 1 }
  0x1a   : > { %p2390_p5 = scmp.ge.s32.totalorder %s3010_s27, 1  ;;  %p529_p7 = scmp.lt.s32.totalorder %s3010_s27, 3 }
  0x1b   : > { %p3174_p4 = por %p3709_p1, %p62_p0  ;;  %p3179_p6 = por %p470_p3, %p62_p0 }
  0x1c   : > { %p3184_p8 = pnand %p2390_p5, %p529_p7  ;;  %s3012_s30 = smov [#allocation5]  }
  0x1d   : > { %s3742_s29 = scalar_select %p3174_p4, 1, 0 }
  0x1e   : > { %s3743_s0 = scalar_select %p3179_p6, 1, 0 }
  0x1f   : > { %s3745_s4 = scalar_select %p3184_p8, 1, 0 }
  0x20   : > { %3744 = sst [smem:[#allocation19_spill]] %s3743_s0  ;;  %s565_s5 = sshll.u32 %s3012_s30, 4  ;;  %s566_s5 = int_to_ptr.vmem [resolvable:$true] %s565_s5 }
  0x21   : > { %p2679_p9 = pneg %p3184_p8  ;;  %s3013_s23 = smov [#allocation7]  }
  0x22   : > { %s587_s1 = sshll.u32 %s3013_s23, 4  ;;  %s2817_s24 = scalar_lea.vmem %s566_s5, 256  ;;  %s588_s1 = int_to_ptr.vmem [resolvable:$true] %s587_s1 }
  0x23   : > { %p3193_p11 = pnand %p2679_p9, %p3709_p1  ;;  %p2818_p13 = scmp.ne.s32.totalorder %s566_s5, %s2817_s24 }
  0x24   : > { %p2825_p5 = scmp.lt.s32.totalorder %s566_s5, %s566_s5  ;;  %p2826_p7 = scmp.lt.s32.totalorder %s2817_s24, %s2817_s24 }
  0x25   : > { %p2808_p12 = pneg %p3193_p11 }
  0x26   : > { %p2827_p10 = por %p2826_p7, %p2825_p5 }
  0x27   : > { %p2820_p0 = pnand %p2818_p13, %p2808_p12 }
  0x29   : > { %p2821_p3 = pneg %p2820_p0 }
  0x2b   : > { %p2828_p9 = pnand %p2827_p10, %p2821_p3 }
  0x2d   : > { %2831 = shalt.err (!%p2828_p9)
}
  0x2e   : > { %s3014_s30 = smov 64   ;;  %s3015_s28 = smov 4  }
  0x2f   : > { %s3747_s9 = sld [smem:[#allocation30_spill]]  ;;  %s2843_s2 = scalar_lea.vmem %s588_s1, 256 }
  0x30   : > { %p2844_p1 = scmp.ne.s32.totalorder %s588_s1, %s2843_s2  ;;  %p2851_p2 = scmp.lt.s32.totalorder %s588_s1, %s588_s1 }
  0x31   : > { %p2852_p6 = scmp.lt.s32.totalorder %s2843_s2, %s2843_s2 }
  0x32   : > { %p2846_p13 = pnand %p2844_p1, %p2808_p12 }
  0x33   : > { %p2853_p5 = por %p2852_p6, %p2851_p2 }
  0x34   : > { %p2847_p0 = pneg %p2846_p13 }
  0x35   : > { %2682 = dma.hbm_to_vmem [thread:$0]  (!%p3193_p11), %s3747_s9, 256, %s566_s5, [#allocation6], %s3014_s30, %s3014_s30, %s3015_s28  }
  0x36   : > { %p2854_p10 = pnand %p2853_p5, %p2847_p0 }
  0x38   : > { %2857 = shalt.err (!%p2854_p10)
}
  0x39   : > { %s3748_s13 = sld [smem:[#allocation31_spill]]  ;;  %s3216_s2 = sadd.s32 1, %s3010_s27  }
  0x3a   : > { %3749 = sst [smem:[#allocation20_spill]] %s3216_s2  ;;  %s49_s0 = sadd.s32 1, %s3006_s26 }
  0x3b   : > { %s46_s5 = ssub.s32 %s3010_s27, %s3216_s2  ;;  %p56_p1 = scmp.ne.s32.totalorder %s3006_s26, %s3002_s25 }
  0x3c   : > { %p47_p2 = scmp.eq.s32.totalorder %s46_s5, 0  ;;  %p57_p6 = scmp.eq.s32.totalorder %s3010_s27, 0 }
  0x3d   : > { %p3750_p12 = scmp.eq.s32.totalorder %s3163_s3, 1  ;;  %p2702_p7 = scmp.lt.s32.totalorder %s3010_s27, 2 }
  0x3e   : > { %s3232_s22 = scalar_select %p47_p2, %s3006_s26, %s49_s0  }
  0x3f   : > { %2685 = dma.hbm_to_vmem [thread:$0]  (!%p3193_p11), %s3748_s13, 256, %s588_s1, [#allocation6], %s3014_s30, %s3014_s30, %s3015_s28  }
  0x40   : > { %p3226_p3 = por %p3750_p12, %p56_p1  ;;  %3752 = sst [smem:[#allocation21_spill]] %s3232_s22 }
  0x41   : > { %p58_p9 = por %p57_p6, %p56_p1  ;;  %s616_s23 = sand.u32 1, %s3006_s26  }
  0x42   : > { %s3751_s19 = scalar_select %p3226_p3, 1, 0 }
  0x43   : > { %s2394_s24 = sshll.u32 %s616_s23, 2  ;;  %s2395_s28 = sshll.u32 %s3010_s27, 6 }
  0x44   : > { %s3753_s9 = sld [smem:[#allocation22_spill]]  ;;  %s620_s5 = scalar_lea.vmem [#allocation2], %s2394_s24 }
  0x45   : > { %s627_s2 = sshll.u32 %s620_s5, 4  ;;  %p3241_p11 = pnand %p2702_p7, %p58_p9  ;;  %s628_s2 = int_to_ptr.vmem [resolvable:$true] %s627_s2 }
  0x46   : > { %s617_s0 = scalar_lea.sflag [#allocation3], %s616_s23 }
  0x47   : > { %p2860_p0 = pneg %p3241_p11 }
  0x4a   : > { %s3239_s13 = scalar_lea.hbm %s3753_s9, %s2395_s28  ;;  %s2863_s30 = scalar_lea.hbm %s3753_s9, 128 }
  0x4b   : > { %s2858_s22 = scalar_lea.hbm %s3239_s13, 64  ;;  %p2864_p1 = scmp.lt.s32.totalorder %s3239_s13, %s3753_s9 }
  0x4c   : > { %p2859_p13 = scmp.ne.s32.totalorder %s3239_s13, %s2858_s22  ;;  %p2865_p2 = scmp.lt.s32.totalorder %s2863_s30, %s2858_s22 }
  0x4e   : > { %p2861_p5 = pnand %p2860_p0, %p2859_p13  ;;  %p2866_p6 = por %p2865_p2, %p2864_p1 }
  0x50   : > { %p2862_p10 = pneg %p2861_p5 }
  0x52   : > { %p2867_p12 = pnand %p2866_p6, %p2862_p10 }
  0x54   : > { %2870 = shalt.err (!%p2867_p12)
}
  0x55   : > { %s2871_s5 = scalar_lea.vmem %s628_s2, 64  ;;  %s3016_s23 = smov [#allocation2]  }
  0x56   : > { %p2872_p7 = scmp.ne.s32.totalorder %s628_s2, %s2871_s5  ;;  %s2876_s27 = sshll.u32 %s3016_s23, 4  ;;  %s2877_s27 = int_to_ptr.vmem [resolvable:$false] %s2876_s27 }
  0x57   : > { %s2878_s17 = scalar_lea.vmem %s2877_s27, 128  ;;  %p2879_p13 = scmp.lt.s32.totalorder %s628_s2, %s2877_s27 }
  0x58   : > { %p2874_p9 = pnand %p2872_p7, %p2860_p0  ;;  %p2880_p5 = scmp.lt.s32.totalorder %s2878_s17, %s2871_s5 }
  0x5a   : > { %p2875_p3 = pneg %p2874_p9  ;;  %p2881_p4 = por %p2880_p5, %p2879_p13 }
  0x5c   : > { %p2882_p8 = pnand %p2881_p4, %p2875_p3 }
  0x5e   : > { %2885 = shalt.err (!%p2882_p8)
}
  0x5f   : > { %2689 = dma.hbm_to_vmem [thread:$0]  (!%p3241_p11), %s3239_s13, 64, %s628_s2, %s617_s0  }
  0x60   : > { %p3755_p10 = scmp.ne.s32.totalorder %s3745_s4, 0 }
  0x61   : > { %s3262_s26 = sand.u32 (!%p3755_p10), 1, %s3002_s25   ;;  %p3756_p0 = scmp.ne.s32.totalorder (!%p3755_p10), %s3742_s29, 0 }
  0x62   : > { %636 = sbr.rel (%p3755_p10) target bundleno = 4376 (0x1118), region = 96  ;;  %s2397_s22 = sshll.u32 (!%p3755_p10), %s3262_s26, 2 }
  0x63   : > { %s639_s28 = scalar_lea.sflag (!%p3755_p10), [#allocation3], %s3262_s26  ;;  %s642_s27 = scalar_lea.vmem (!%p3755_p10), [#allocation2], %s2397_s22 }
  0x67   : > { %2981 = dma.done.wait (%p3756_p0), %s639_s28, 64  }
  0x68   : > { %2983 = vsyncadd (%p3756_p0), %s639_s28, 4294967232  ;;  %p3757_p4 = scmp.eq.s32.totalorder %s3163_s3, 0 }
  0x6a   : > { %2985 = dma.done.wait (%p3757_p4), [#allocation6], 512   ;;  %p3758_p8 = pmov %p3757_p4 }
  0x6b   : > { %v3017_v0 = vmov 0.0   ;;  %vm3018_vm0 = vmmov 0   ;;  %s3759_s18 = sld [smem:[#allocation23_spill]]  ;;  %vm751_vm1 = vcmask 261120   ;;  %v3287_v3 = vld [vmem:[%s642_s27] sm:$0xf]  ;;  %v720_v25 = vlaneseq }
  0x6c   : > { %2987 = vsyncadd (%p3758_p8), [#allocation6], 4294966784  ;;  %2515 = vmatprep.subr.bf16.mxu0 %v3017_v0  ;;  %2519 = vmatprep.mubr.msk.bf16.mxu0 %vm3018_vm0, %v3017_v0  ;;  %s3760_s1 = sld [smem:[#allocation24_spill]]  ;;  %s3019_s30 = smov 104   ;;  %vm812_vm2 = vcmask 64512   ;;  %vm1064_vm4 = vcmask 1043456  }
  0x6d   : > { %2523 = vmatprep.subr.bf16.mxu1 %v3017_v0  ;;  %2525 = vmatprep.mubr.msk.bf16.mxu1 %vm3018_vm0, %v3017_v0  ;;  %s3020_s24 = smov 120   ;;  %s3021_s5 = smov 112   ;;  %v721_v26 = vshrl.u32 %v720_v25, 7  ;;  %v723_v27 = vand.u32 127, %v720_v25  ;;  %v3023_v28 = vmov -1e+09  }
  0x6e   : > { %s3022_s23 = smov 96   ;;  %s3723_s22 = smov 64   ;;  %vm1054_vm5 = vcmask 60416   ;;  %vm1265_vm6 = vcmask 130048   ;;  %vm1267_vm7 = vcmask 195584   ;;  %vm2108_vm8 = vcmask 523264  }
  0x6f   : > { %vm724_vm3 = vcmp.ge.s32.totalorder %v721_v26, %v723_v27  ;;  %s3722_s28 = sshll.u32 %s3262_s26, 4  ;;  %s3761_s29 = sld [smem:[#allocation25_spill]] }
  0x70   : > { %v725_v29 = vsel %vm724_vm3, 0.0, %v3023_v28  ;;  %s3363_s27 = scalar_lea.vmem [#allocation9], %s3722_s28  ;;  %s3721_s0 = smov 8  }
  0x71   : > { %v2754_v1 = vld [vmem:[%s3759_s18 + $0x8] sm:$0xff]   ;;  %v2755_v2 = vld [vmem:[%s3759_s18] sm:$0xff]   ;;  %s3719_s13 = smov 24   ;;  %s3762_s2 = sld [smem:[#allocation26_spill]] }
  0x72   : > { %2516 = vmatpush3.bf16.msra.mxu0 %v2754_v1  ;;  %v2403_v4 = vld [vmem:[%s3760_s1] ss:$0 sm:$0xff]  ;;  %s3720_s1 = smov 16   ;;  %s3763_s7 = sld [smem:[#allocation29_spill]] }
  0x73   : > { %2517 = vmatprep.subr.bf16.mxu0 %v3017_v0  ;;  %s3764_s28 = sld [smem:[#allocation27_spill]]  ;;  %s2220_s4 = sshll.u32 %s3363_s27, 4  ;;  %s3579_s4 = int_to_ptr.vmem [resolvable:$true] %s2220_s4 }
  0x74   : > { %s3765_s6 = sld [smem:[#allocation28_spill]]  ;;  %p3770_p11 = scmp.ne.s32.totalorder %s3751_s19, 0 }
  0x76   : > { %2518 = vmatpush3.bf16.msra.mxu0 %v2755_v2 }
  0x77   : > { %2529 = vmatprep.subr.bf16.mxu0 %v3017_v0 }
  0x79   : > { %2520 = vmatmul.mubr.msk.bf16.vlgmr.msra.gmra.mxu0 %vm751_vm1, %v3287_v3 }
  0x7a   : > { %2531 = vmatprep.mubr.msk.bf16.mxu0 %vm3018_vm0, %v3017_v0 }
 0x139   : > { %v789_v5 = vpop.f32.mrf.mxu0 }
 0x13a   : > { %v790_v6 = vadd.f32 %v2403_v4, %v789_v5 }
 0x13b   : > { %v2521_v7 = vpop.f32.mrf.mxu0 }
 0x13c   : > { %802 = vrot.lane.b32.xlu1 %v790_v6, %s3019_s30  ;;  %796 = vrot.lane.b32.xlu0 %v790_v6, %s3020_s24  ;;  %v3299_v9 = vpack.c.bf16 %v790_v6, %v790_v6 }
 0x13d   : > { %v792_v8 = vpop.f32.mrf.mxu0 }
 0x13f   : > { %v2522_v10 = vpop.f32.mrf.mxu0 }
 0x140   : > { %799 = vrot.lane.b32.xlu0 %v790_v6, %s3021_s5  ;;  %810 = vrot.lane.b32.xlu1 %v3299_v9, %s3022_s23 }
 0x1ae   : > { %v803_v11 = vpop.permute.xlu1 %802  ;;  %v797_v12 = vpop.permute.xlu0 %796 }
 0x1af   : > { %v3304_v13 = vpack.c.bf16 %v797_v12, %v797_v12  ;;  %v3308_v16 = vpack.c.bf16 %v803_v11, %v803_v11 }
 0x1b1   : > { %860 = vrot.lane.b32.xlu0 %v3304_v13, %s3022_s23 }
 0x1b2   : > { %v800_v14 = vpop.permute.xlu0 %799  ;;  %v811_v15 = vpop.permute.xlu1 %810 }
 0x1b3   : > { %v3310_v17 = vpack.c.bf16 %v800_v14, %v800_v14  ;;  %v817_v18 = vsel %vm812_vm2, %v811_v15, 0 }
 0x1b4   : > { %2524 = vmatpush3.bf16.xpose.msra.mxu1 %v817_v18 }
 0x1b5   : > { %958 = vrot.lane.b32.xlu0 %v3308_v16, %s3022_s23  ;;  %909 = vrot.lane.b32.xlu1 %v3310_v17, %s3022_s23 }
 0x1b6   : > { %2535 = vmatprep.subr.bf16.mxu1 %v3017_v0 }
 0x1bb   : > { %2526 = vmatmul.mubr.msk.bf16.vlgmr.msra.gmra.mxu1 %vm812_vm2, %v3299_v9 }
 0x1bc   : > { %2537 = vmatprep.mubr.msk.bf16.mxu1 %vm3018_vm0, %v3017_v0 }
 0x223   : > { %v861_v19 = vpop.permute.xlu0 %860 }
 0x224   : > { %v866_v20 = vsel %vm812_vm2, %v861_v19, 0 }
 0x225   : > { %2530 = vmatpush3.bf16.xpose.msra.mxu0 %v866_v20 }
 0x226   : > { %2541 = vmatprep.subr.bf16.mxu0 %v3017_v0 }
 0x227   : > { %v910_v21 = vpop.permute.xlu1 %909  ;;  %v959_v23 = vpop.permute.xlu0 %958 }
 0x228   : > { %v915_v22 = vsel %vm812_vm2, %v910_v21, 0  ;;  %v964_v24 = vsel %vm812_vm2, %v959_v23, 0 }
 0x229   : > { %2536 = vmatpush3.bf16.xpose.msra.mxu1 %v915_v22 }
 0x22a   : > { %2547 = vmatprep.subr.bf16.mxu1 %v3017_v0 }
 0x22c   : > { %2532 = vmatmul.mubr.msk.bf16.vlgmr.msra.gmra.mxu0 %vm812_vm2, %v3304_v13 }
 0x22d   : > { %2542 = vmatpush3.bf16.xpose.msra.mxu0 %v964_v24  ;;  %2543 = vmatprep.mubr.msk.bf16.mxu0 %vm3018_vm0, %v3017_v0 }
 0x22e   : > { %2553 = vmatprep.subr.bf16.mxu0 %v3017_v0 }
 0x230   : > { %2538 = vmatmul.mubr.msk.bf16.vlgmr.msra.gmra.mxu1 %vm812_vm2, %v3310_v17 }
 0x231   : > { %2549 = vmatprep.mubr.msk.bf16.mxu1 %vm3018_vm0, %v3017_v0 }
 0x234   : > { %2544 = vmatmul.mubr.msk.bf16.vlgmr.msra.gmra.mxu0 %vm812_vm2, %v3308_v16 }
 0x235   : > { %2555 = vmatprep.mubr.msk.bf16.mxu0 %vm3018_vm0, %v3017_v0 }
 0x27b   : > { %v853_v30 = vpop.f32.mrf.mxu1 }
 0x27c   : > { %v854_v31 = vadd.f32 %v853_v30, %v725_v29 }
 0x27d   : > { %v2527_v32 = vpop.f32.mrf.mxu1 }
 0x27e   : > { %v1006_v33 = vsel %vm812_vm2, %v854_v31, -inf }
 0x27f   : > { %1007 = vmax.xlane.f32.xlu1 %v1006_v33  ;;  %v856_v34 = vpop.f32.mrf.mxu1 }
 0x281   : > { %v2528_v35 = vpop.f32.mrf.mxu1 }
 0x2ec   : > { %v902_v36 = vpop.f32.mrf.mxu0 }
 0x2ed   : > { %v903_v37 = vadd.f32 %v902_v36, %v725_v29 }
 0x2ee   : > { %v2533_v38 = vpop.f32.mrf.mxu0 }
 0x2ef   : > { %v1009_v39 = vsel %vm812_vm2, %v903_v37, -inf }
 0x2f0   : > { %v951_v40 = vpop.f32.mrf.mxu1  ;;  %1010 = vmax.xlane.f32.xlu0 %v1009_v39  ;;  %v905_v41 = vpop.f32.mrf.mxu0 }
 0x2f1   : > { %v952_v42 = vadd.f32 %v951_v40, %v725_v29  ;;  %v2756_v40 = vld [vmem:[%s3761_s29 + $0x8] sm:$0xff]   ;;  %v2757_v41 = vld [vmem:[%s3761_s29] sm:$0xff]  }
 0x2f2   : > { %v2534_v43 = vpop.f32.mrf.mxu0  ;;  %v2539_v44 = vpop.f32.mrf.mxu1 }
 0x2f3   : > { %v1012_v45 = vsel %vm812_vm2, %v952_v42, -inf }
 0x2f4   : > { %v954_v46 = vpop.f32.mrf.mxu1  ;;  %1013 = vmax.xlane.f32.xlu0 %v1012_v45  ;;  %v1000_v47 = vpop.f32.mrf.mxu0 }
 0x2f5   : > { %v1001_v48 = vadd.f32 %v1000_v47, %v725_v29 }
 0x2f6   : > { %v2540_v49 = vpop.f32.mrf.mxu1  ;;  %v2545_v50 = vpop.f32.mrf.mxu0 }
 0x2f7   : > { %v1015_v51 = vsel %vm812_vm2, %v1001_v48, -inf }
 0x2f8   : > { %1016 = vmax.xlane.f32.xlu1 %v1015_v51  ;;  %v1003_v52 = vpop.f32.mrf.mxu0 }
 0x2fa   : > { %v2546_v53 = vpop.f32.mrf.mxu0 }
 0x308   : > { %v1008_v54 = vpop.xlane.xlu1 %1007 }
 0x309   : > { %1108 = vrot.lane.b32.xlu1 %v3304_v13, %s3723_s22  ;;  %v1018_v55 = vsub.f32 %v854_v31, %v1008_v54 }
 0x30a   : > { %1059 = vrot.lane.b32.xlu0 %v3299_v9, %s3723_s22 }
 0x30b   : > { %v1022_v56 = vmul.f32 1.442695, %v1018_v55 }
 0x30d   : > { %2768 = vpow2.f32 %v1022_v56 }
 0x31a   : > { %v2769_v57 = vpop.eup %2768 }
 0x31b   : > { %v1030_v58 = vsel %vm812_vm2, %v2769_v57, 0.0 }
 0x329   : > { %1031 = vadd.xlane.f32.xlu0 %v1030_v58 }
 0x379   : > { %v1011_v59 = vpop.xlane.xlu0 %1010 }
 0x37a   : > { %v1019_v60 = vsub.f32 %v903_v37, %v1011_v59 }
 0x37c   : > { %v1024_v61 = vmul.f32 1.442695, %v1019_v60 }
 0x37d   : > { %v1014_v62 = vpop.xlane.xlu0 %1013 }
 0x37e   : > { %2770 = vpow2.f32 %v1024_v61  ;;  %v1020_v63 = vsub.f32 %v952_v42, %v1014_v62  ;;  %v2415_v61 = vld [vmem:[%s3762_s2] ss:$0 sm:$0xff]  ;;  %v727_v62 = vunpack.c.l.bf16 %v3287_v3  ;;  %v2758_v3 = vld [vmem:[%s3763_s7 + $0x8] sm:$0xff]   ;;  %s2886_s2 = scalar_lea.vmem %s3579_s4, 256 }
 0x37f   : > { %p2887_p3 = scmp.ne.s32.totalorder %s3579_s4, %s2886_s2 }
 0x380   : > { %v1026_v1 = vmul.f32 1.442695, %v1020_v63 }
 0x381   : > { %v1060_v2 = vpop.permute.xlu0 %1059  ;;  %v1017_v4 = vpop.xlane.xlu1 %1016  ;;  %p2888_p1 = pnand %p2887_p3, %p3770_p11 }
 0x382   : > { %2772 = vpow2.f32 %v1026_v1  ;;  %v1066_v5 = vsel %vm1064_vm4, %v1060_v2, 0  ;;  %v1021_v6 = vsub.f32 %v1001_v48, %v1017_v4 }
 0x383   : > { %2548 = vmatpush3.bf16.msra.mxu1 %v1066_v5  ;;  %p2889_p2 = pneg %p2888_p1 }
 0x384   : > { %v1028_v7 = vmul.f32 1.442695, %v1021_v6  ;;  %2559 = vmatprep.subr.bf16.mxu1 %v3017_v0 }
 0x385   : > { %v1109_v8 = vpop.permute.xlu1 %1108 }
 0x386   : > { %2774 = vpow2.f32 %v1028_v7  ;;  %v1114_v9 = vsel %vm1064_vm4, %v1109_v8, 0 }
 0x387   : > { %2554 = vmatpush3.bf16.msra.mxu0 %v1114_v9 }
 0x388   : > { %2565 = vmatprep.subr.bf16.mxu0 %v3017_v0 }
 0x38b   : > { %v2771_v10 = vpop.eup %2770 }
 0x38c   : > { %v1033_v11 = vsel %vm812_vm2, %v2771_v10, 0.0 }
 0x38d   : > { %1034 = vadd.xlane.f32.xlu1 %v1033_v11 }
 0x38f   : > { %v2773_v12 = vpop.eup %2772 }
 0x390   : > { %v1036_v13 = vsel %vm812_vm2, %v2773_v12, 0.0 }
 0x391   : > { %1037 = vadd.xlane.f32.xlu0 %v1036_v13  ;;  %v2759_v13 = vld [vmem:[%s3763_s7] sm:$0xff]  }
 0x393   : > { %v2775_v14 = vpop.eup %2774 }
 0x394   : > { %v1039_v15 = vsel %vm812_vm2, %v2775_v14, 0.0 }
 0x395   : > { %1040 = vadd.xlane.f32.xlu1 %v1039_v15 }
 0x3a6   : > { %1156 = vrot.lane.b32.xlu1 %v3310_v17, %s3723_s22 }
 0x3a7   : > { %1204 = vrot.lane.b32.xlu0 %v3308_v16, %s3723_s22 }
 0x3b2   : > { %v1032_v18 = vpop.xlane.xlu0 %1031 }
 0x3b3   : > { %2776 = vrcp.f32 %v1032_v18 }
 0x3c0   : > { %v2777_v19 = vpop.eup %2776 }
 0x3c1   : > { %v1046_v20 = vmul.f32 %v2777_v19, %v2769_v57 }
 0x3c3   : > { %v1050_v21 = vpack.c.bf16 %v1046_v20, %v1046_v20  ;;  %v2419_v20 = vld [vmem:[%s3764_s28] ss:$0 sm:$0xff]  ;;  %s3769_s28 = smov 24  }
 0x3c5   : > { %1055 = vst.msk [vmem:[%s3363_s27] sm:$0xf] %vm1054_vm5, %v1050_v21  ;;  %2550 = vmatmul.mubr.msk.bf16.vlgmr.msra.gmra.mxu1 %vm812_vm2, %v1050_v21 }
 0x3c6   : > { %2561 = vmatprep.mubr.msk.bf16.mxu1 %vm3018_vm0, %v3017_v0 }
 0x416   : > { %v1035_v17 = vpop.xlane.xlu1 %1034 }
 0x417   : > { %2778 = vrcp.f32 %v1035_v17  ;;  %v2420_v17 = vld [vmem:[%s3765_s6] ss:$0 sm:$0xff] }
 0x41a   : > { %v1038_v16 = vpop.xlane.xlu0 %1037 }
 0x41b   : > { %2780 = vrcp.f32 %v1038_v16 }
 0x41e   : > { %v1041_v22 = vpop.xlane.xlu1 %1040  ;;  %v1205_v27 = vpop.permute.xlu0 %1204 }
 0x41f   : > { %2782 = vrcp.f32 %v1041_v22  ;;  %v1210_v30 = vsel %vm1064_vm4, %v1205_v27, 0 }
 0x422   : > { %v1157_v23 = vpop.permute.xlu1 %1156 }
 0x423   : > { %v1162_v24 = vsel %vm1064_vm4, %v1157_v23, 0 }
 0x424   : > { %v2779_v25 = vpop.eup %2778  ;;  %2560 = vmatpush3.bf16.msra.mxu1 %v1162_v24  ;;  %v2421_v24 = vld [vmem:[%s3689_s8] ss:$0 sm:$0xff] }
 0x425   : > { %v1047_v26 = vmul.f32 %v2779_v25, %v2771_v10  ;;  %2571 = vmatprep.subr.bf16.mxu1 %v3017_v0 }
 0x427   : > { %v1051_v28 = vpack.c.bf16 %v1047_v26, %v1047_v26 }
 0x428   : > { %v2781_v29 = vpop.eup %2780 }
 0x429   : > { %1056 = vst.msk [vmem:[%s3363_s27 + $0x4] sm:$0xf] %vm1054_vm5, %v1051_v28  ;;  %2556 = vmatmul.mubr.msk.bf16.vlgmr.msra.gmra.mxu0 %vm812_vm2, %v1051_v28  ;;  %v1048_v31 = vmul.f32 %v2781_v29, %v2773_v12 }
 0x42a   : > { %2566 = vmatpush3.bf16.msra.mxu0 %v1210_v30  ;;  %2567 = vmatprep.mubr.msk.bf16.mxu0 %vm3018_vm0, %v3017_v0 }
 0x42b   : > { %v1052_v32 = vpack.c.bf16 %v1048_v31, %v1048_v31  ;;  %2579 = vmatprep.subr.bf16.mxu0 %v3017_v0 }
 0x42c   : > { %v2783_v33 = vpop.eup %2782 }
 0x42d   : > { %1057 = vst.msk [vmem:[%s3363_s27 + $0x8] sm:$0xf] %vm1054_vm5, %v1052_v32  ;;  %2562 = vmatmul.mubr.msk.bf16.vlgmr.msra.gmra.mxu1 %vm812_vm2, %v1052_v32  ;;  %v1049_v34 = vmul.f32 %v2783_v33, %v2775_v14 }
 0x42e   : > { %2575 = vmatprep.mubr.msk.bf16.mxu1 %vm3018_vm0, %v3017_v0  ;;  %2572 = vmatpush3.bf16.msra.mxu1 %v2756_v40 }
 0x42f   : > { %v1053_v35 = vpack.c.bf16 %v1049_v34, %v1049_v34  ;;  %2573 = vmatprep.subr.bf16.mxu1 %v3017_v0 }
 0x431   : > { %1058 = vst.msk [vmem:[%s3363_s27 + $0xc] sm:$0xf] %vm1054_vm5, %v1053_v35  ;;  %2568 = vmatmul.mubr.msk.bf16.vlgmr.msra.gmra.mxu0 %vm812_vm2, %v1053_v35 }
 0x432   : > { %2583 = vmatprep.mubr.msk.bf16.mxu0 %vm3018_vm0, %v3017_v0  ;;  %2574 = vmatpush3.bf16.msra.mxu1 %v2757_v41 }
 0x433   : > { %2587 = vmatprep.subr.bf16.mxu1 %v3017_v0  ;;  %2580 = vmatpush3.bf16.msra.mxu0 %v2758_v3 }
 0x434   : > { %2581 = vmatprep.subr.bf16.mxu0 %v3017_v0 }
 0x437   : > { %2582 = vmatpush3.bf16.msra.mxu0 %v2759_v13 }
 0x438   : > { %2593 = vmatprep.subr.bf16.mxu0 %v3017_v0 }
 0x485   : > { %v1102_v36 = vpop.f32.mrf.mxu1 }
 0x487   : > { %v2551_v37 = vpop.f32.mrf.mxu1 }
 0x489   : > { %v1105_v38 = vpop.f32.mrf.mxu1 }
 0x48b   : > { %v2552_v39 = vpop.f32.mrf.mxu1 }
 0x4e9   : > { %v1150_v42 = vpop.f32.mrf.mxu0 }
 0x4ea   : > { %1253 = vrot.lane.b32.xlu1 %v1150_v42, %s3721_s0 }
 0x4eb   : > { %v2557_v43 = vpop.f32.mrf.mxu0 }
 0x4ed   : > { %v1153_v44 = vpop.f32.mrf.mxu0  ;;  %v1198_v45 = vpop.f32.mrf.mxu1 }
 0x4ee   : > { %1257 = vrot.lane.b32.xlu0 %v1198_v45, %s3720_s1 }
 0x4ef   : > { %v2558_v46 = vpop.f32.mrf.mxu0  ;;  %v2563_v47 = vpop.f32.mrf.mxu1 }
 0x4f1   : > { %v1201_v48 = vpop.f32.mrf.mxu1  ;;  %v1246_v49 = vpop.f32.mrf.mxu0 }
 0x4f2   : > { %1261 = vrot.lane.b32.xlu1 %v1246_v49, %s3719_s13 }
 0x4f3   : > { %v2564_v50 = vpop.f32.mrf.mxu1  ;;  %v2569_v51 = vpop.f32.mrf.mxu0 }
 0x4f5   : > { %v1249_v52 = vpop.f32.mrf.mxu0 }
 0x4f7   : > { %v2570_v53 = vpop.f32.mrf.mxu0 }
 0x55c   : > { %v1254_v54 = vpop.permute.xlu1 %1253 }
 0x55d   : > { %v1264_v56 = vsel %vm812_vm2, %v1102_v36, %v1254_v54 }
 0x560   : > { %v1258_v55 = vpop.permute.xlu0 %1257 }
 0x561   : > { %v1266_v57 = vsel %vm1265_vm6, %v1264_v56, %v1258_v55 }
 0x564   : > { %v1262_v58 = vpop.permute.xlu1 %1261 }
 0x565   : > { %v1268_v59 = vsel %vm1267_vm7, %v1266_v57, %v1262_v58 }
 0x566   : > { %v1269_v60 = vpack.c.bf16 %v1268_v59, %v1268_v59 }
 0x568   : > { %2576 = vmatmul.mubr.msk.bf16.vlgmr.msra.gmra.mxu1 %vm751_vm1, %v1269_v60 }
 0x569   : > { %2589 = vmatprep.mubr.msk.bf16.mxu1 %vm3018_vm0, %v3017_v0 }
 0x628   : > { %v1330_v63 = vpop.f32.mrf.mxu1 }
 0x629   : > { %v1331_v1 = vadd.f32 %v2415_v61, %v1330_v63 }
 0x62a   : > { %v2577_v2 = vpop.f32.mrf.mxu1 }
 0x62b   : > { %v1336_v4 = vadd.f32 %v1331_v1, %v727_v62 }
 0x62c   : > { %v1333_v5 = vpop.f32.mrf.mxu1 }
 0x62d   : > { %v1339_v6 = vsel %vm751_vm1, %v1336_v4, 0.0 }
 0x62e   : > { %v2578_v7 = vpop.f32.mrf.mxu1  ;;  %1340 = vadd.xlane.f32.xlu0 %v1339_v6 }
 0x6b7   : > { %v1341_v8 = vpop.xlane.xlu0 %1340 }
 0x6b8   : > { %v1343_v9 = vmul.f32 0.03125, %v1341_v8 }
 0x6ba   : > { %v1344_v10 = vsub.f32 %v1336_v4, %v1343_v9 }
 0x6bc   : > { %v1345_v11 = vmul.f32 %v1344_v10, %v1344_v10 }
 0x6be   : > { %v1346_v12 = vsel %vm751_vm1, %v1345_v11, 0.0 }
 0x6bf   : > { %1347 = vadd.xlane.f32.xlu1 %v1346_v12 }
 0x748   : > { %v1348_v14 = vpop.xlane.xlu1 %1347 }
 0x749   : > { %v1349_v15 = vmul.f32 0.03125, %v1348_v14 }
 0x74b   : > { %v1350_v18 = vadd.f32 1e-05, %v1349_v15 }
 0x74d   : > { %2784 = vrsqrt.f32 %v1350_v18 }
 0x75a   : > { %v2785_v19 = vpop.eup %2784 }
 0x75b   : > { %v1352_v21 = vmul.f32 %v2785_v19, %v1344_v10 }
 0x75d   : > { %v1359_v16 = vmul.f32 %v2419_v20, %v1352_v21 }
 0x75f   : > { %v3426_v22 = vadd.f32 %v2420_v17, %v1359_v16 }
 0x761   : > { %v1367_v23 = vpack.c.bf16 %v3426_v22, %v3426_v22 }
 0x763   : > { %2584 = vmatmul.mubr.msk.bf16.vlgmr.msra.gmra.mxu0 %vm751_vm1, %v1367_v23 }
 0x764   : > { %2595 = vmatprep.mubr.msk.bf16.mxu0 %vm3018_vm0, %v3017_v0 }
 0x823   : > { %v1428_v25 = vpop.f32.mrf.mxu0 }
 0x824   : > { %v1429_v26 = vadd.f32 %v2421_v24, %v1428_v25 }
 0x825   : > { %v2585_v27 = vpop.f32.mrf.mxu0 }
 0x826   : > { %1438 = vrot.lane.b32.xlu1 %v1429_v26, %s3021_s5  ;;  %1435 = vrot.lane.b32.xlu0 %v1429_v26, %s3020_s24  ;;  %v1444_v29 = vpack.c.bf16 %v1429_v26, %v1429_v26  ;;  %s3767_s5 = smov 8  }
 0x827   : > { %v1431_v28 = vpop.f32.mrf.mxu0 }
 0x829   : > { %v2586_v30 = vpop.f32.mrf.mxu0 }
 0x82a   : > { %1441 = vrot.lane.b32.xlu0 %v1429_v26, %s3019_s30  ;;  %1449 = vrot.lane.b32.xlu1 %v1444_v29, %s3022_s23  ;;  %s3766_s30 = sshll.u32 %s3262_s26, 4 }
 0x82b   : > { %s3491_s24 = scalar_lea.vmem [#allocation11], %s3766_s30  ;;  %s3028_s30 = smov [#allocation9]  }
 0x898   : > { %v1439_v31 = vpop.permute.xlu1 %1438  ;;  %v1436_v32 = vpop.permute.xlu0 %1435 }
 0x899   : > { %v3440_v33 = vpack.c.bf16 %v1439_v31, %v1439_v31  ;;  %v1445_v34 = vpack.c.bf16 %v1436_v32, %v1436_v32 }
 0x89b   : > { %1498 = vrot.lane.b32.xlu0 %v1445_v34, %s3022_s23  ;;  %1547 = vrot.lane.b32.xlu1 %v3440_v33, %s3022_s23 }
 0x89c   : > { %v1442_v35 = vpop.permute.xlu0 %1441  ;;  %v1450_v36 = vpop.permute.xlu1 %1449 }
 0x89d   : > { %v3445_v37 = vpack.c.bf16 %v1442_v35, %v1442_v35  ;;  %v1455_v38 = vsel %vm812_vm2, %v1450_v36, 0 }
 0x89e   : > { %2588 = vmatpush3.bf16.xpose.msra.mxu1 %v1455_v38 }
 0x89f   : > { %1596 = vrot.lane.b32.xlu0 %v3445_v37, %s3022_s23  ;;  %2599 = vmatprep.subr.bf16.mxu1 %v3017_v0  ;;  %s3768_s23 = smov 16  }
 0x8a5   : > { %2590 = vmatmul.mubr.msk.bf16.vlgmr.msra.gmra.mxu1 %vm812_vm2, %v1444_v29 }
 0x8a6   : > { %2601 = vmatprep.mubr.msk.bf16.mxu1 %vm3018_vm0, %v3017_v0 }
 0x90d   : > { %v1499_v39 = vpop.permute.xlu0 %1498  ;;  %v1548_v40 = vpop.permute.xlu1 %1547 }
 0x90e   : > { %v1504_v41 = vsel %vm812_vm2, %v1499_v39, 0  ;;  %v1553_v42 = vsel %vm812_vm2, %v1548_v40, 0 }
 0x90f   : > { %2594 = vmatpush3.bf16.xpose.msra.mxu0 %v1504_v41  ;;  %2600 = vmatpush3.bf16.xpose.msra.mxu1 %v1553_v42 }
 0x910   : > { %2605 = vmatprep.subr.bf16.mxu0 %v3017_v0  ;;  %2611 = vmatprep.subr.bf16.mxu1 %v3017_v0 }
 0x911   : > { %v1597_v43 = vpop.permute.xlu0 %1596 }
 0x912   : > { %v1602_v44 = vsel %vm812_vm2, %v1597_v43, 0 }
 0x916   : > { %2596 = vmatmul.mubr.msk.bf16.vlgmr.msra.gmra.mxu0 %vm812_vm2, %v1445_v34  ;;  %2602 = vmatmul.mubr.msk.bf16.vlgmr.msra.gmra.mxu1 %vm812_vm2, %v3440_v33 }
 0x917   : > { %2606 = vmatpush3.bf16.xpose.msra.mxu0 %v1602_v44  ;;  %2607 = vmatprep.mubr.msk.bf16.mxu0 %vm3018_vm0, %v3017_v0 }
 0x918   : > { %2617 = vmatprep.subr.bf16.mxu0 %v3017_v0  ;;  %2613 = vmatprep.mubr.msk.bf16.mxu1 %vm3018_vm0, %v3017_v0 }
 0x91e   : > { %2608 = vmatmul.mubr.msk.bf16.vlgmr.msra.gmra.mxu0 %vm812_vm2, %v3445_v37 }
 0x91f   : > { %2619 = vmatprep.mubr.msk.bf16.mxu0 %vm3018_vm0, %v3017_v0 }
 0x965   : > { %v1491_v45 = vpop.f32.mrf.mxu1 }
 0x966   : > { %v1644_v46 = vsel %vm812_vm2, %v1491_v45, -inf }
 0x967   : > { %1645 = vmax.xlane.f32.xlu1 %v1644_v46  ;;  %v2591_v47 = vpop.f32.mrf.mxu1 }
 0x969   : > { %v1494_v48 = vpop.f32.mrf.mxu1 }
 0x96b   : > { %v2592_v49 = vpop.f32.mrf.mxu1 }
 0x9d6   : > { %v1540_v50 = vpop.f32.mrf.mxu0  ;;  %v1589_v51 = vpop.f32.mrf.mxu1 }
 0x9d7   : > { %v1647_v52 = vsel %vm812_vm2, %v1540_v50, -inf  ;;  %v1650_v57 = vsel %vm812_vm2, %v1589_v51, -inf }
 0x9d8   : > { %v2603_v53 = vpop.f32.mrf.mxu1  ;;  %1648 = vmax.xlane.f32.xlu0 %v1647_v52  ;;  %v2597_v54 = vpop.f32.mrf.mxu0  ;;  %v2761_v52 = vld [vmem:[#allocation5] sm:$0xff]  }
 0x9da   : > { %v1543_v55 = vpop.f32.mrf.mxu0  ;;  %v1592_v56 = vpop.f32.mrf.mxu1 }
 0x9dc   : > { %v2604_v58 = vpop.f32.mrf.mxu1  ;;  %1651 = vmax.xlane.f32.xlu0 %v1650_v57  ;;  %v2598_v59 = vpop.f32.mrf.mxu0 }
 0x9de   : > { %v1638_v60 = vpop.f32.mrf.mxu0 }
 0x9df   : > { %v1653_v61 = vsel %vm812_vm2, %v1638_v60, -inf }
 0x9e0   : > { %1654 = vmax.xlane.f32.xlu1 %v1653_v61  ;;  %v2609_v62 = vpop.f32.mrf.mxu0 }
 0x9e2   : > { %v1641_v63 = vpop.f32.mrf.mxu0 }
 0x9e4   : > { %v2610_v1 = vpop.f32.mrf.mxu0 }
 0x9f0   : > { %v1646_v2 = vpop.xlane.xlu1 %1645 }
 0x9f1   : > { %1744 = vrot.lane.b32.xlu1 %v1445_v34, %s3723_s22  ;;  %v1656_v4 = vsub.f32 %v1491_v45, %v1646_v2 }
 0x9f2   : > { %1696 = vrot.lane.b32.xlu0 %v1444_v29, %s3723_s22 }
 0x9f3   : > { %v1660_v5 = vmul.f32 1.442695, %v1656_v4 }
 0x9f5   : > { %2786 = vpow2.f32 %v1660_v5 }
 0xa02   : > { %v2787_v6 = vpop.eup %2786 }
 0xa03   : > { %v1668_v7 = vsel %vm812_vm2, %v2787_v6, 0.0 }
 0xa11   : > { %1669 = vadd.xlane.f32.xlu0 %v1668_v7 }
 0xa61   : > { %v1649_v8 = vpop.xlane.xlu0 %1648 }
 0xa62   : > { %v1657_v9 = vsub.f32 %v1540_v50, %v1649_v8 }
 0xa64   : > { %v1662_v10 = vmul.f32 1.442695, %v1657_v9 }
 0xa65   : > { %v1652_v11 = vpop.xlane.xlu0 %1651 }
 0xa66   : > { %2788 = vpow2.f32 %v1662_v10  ;;  %v1658_v12 = vsub.f32 %v1589_v51, %v1652_v11  ;;  %v2760_v51 = vld [vmem:[#allocation5 + $0x8] sm:$0xff]   ;;  %v2433_v10 = vld [vmem:[%s3691_s10] ss:$0 sm:$0xff] }
 0xa68   : > { %v1664_v3 = vmul.f32 1.442695, %v1658_v12 }
 0xa69   : > { %v1697_v13 = vpop.permute.xlu0 %1696  ;;  %v1655_v14 = vpop.xlane.xlu1 %1654 }
 0xa6a   : > { %2790 = vpow2.f32 %v1664_v3  ;;  %v1702_v15 = vsel %vm1064_vm4, %v1697_v13, 0  ;;  %v1659_v18 = vsub.f32 %v1638_v60, %v1655_v14 }
 0xa6b   : > { %2612 = vmatpush3.bf16.msra.mxu1 %v1702_v15 }
 0xa6c   : > { %v1666_v19 = vmul.f32 1.442695, %v1659_v18  ;;  %2623 = vmatprep.subr.bf16.mxu1 %v3017_v0 }
 0xa6d   : > { %v1745_v20 = vpop.permute.xlu1 %1744 }
 0xa6e   : > { %2792 = vpow2.f32 %v1666_v19  ;;  %v1750_v21 = vsel %vm1064_vm4, %v1745_v20, 0 }
 0xa6f   : > { %2618 = vmatpush3.bf16.msra.mxu0 %v1750_v21 }
 0xa70   : > { %2629 = vmatprep.subr.bf16.mxu0 %v3017_v0 }
 0xa73   : > { %v2789_v17 = vpop.eup %2788 }
 0xa74   : > { %v1671_v16 = vsel %vm812_vm2, %v2789_v17, 0.0 }
 0xa75   : > { %1672 = vadd.xlane.f32.xlu1 %v1671_v16 }
 0xa77   : > { %v2791_v23 = vpop.eup %2790 }
 0xa78   : > { %v1674_v24 = vsel %vm812_vm2, %v2791_v23, 0.0 }
 0xa79   : > { %1675 = vadd.xlane.f32.xlu0 %v1674_v24  ;;  %v2763_v24 = vld [vmem:[#allocation7] sm:$0xff]  }
 0xa7b   : > { %v2793_v25 = vpop.eup %2792 }
 0xa7c   : > { %v1677_v26 = vsel %vm812_vm2, %v2793_v25, 0.0 }
 0xa7d   : > { %1678 = vadd.xlane.f32.xlu1 %v1677_v26 }
 0xa8e   : > { %1792 = vrot.lane.b32.xlu1 %v3440_v33, %s3723_s22 }
 0xa8f   : > { %1840 = vrot.lane.b32.xlu0 %v3445_v37, %s3723_s22 }
 0xa9a   : > { %v1670_v27 = vpop.xlane.xlu0 %1669 }
 0xa9b   : > { %2794 = vrcp.f32 %v1670_v27 }
 0xaa8   : > { %v2795_v28 = vpop.eup %2794 }
 0xaa9   : > { %v1684_v29 = vmul.f32 %v2795_v28, %v2787_v6 }
 0xaab   : > { %v1688_v30 = vpack.c.bf16 %v1684_v29, %v1684_v29 }
 0xaad   : > { %1692 = vst.msk [vmem:[%s3491_s24] sm:$0xf] %vm1054_vm5, %v1688_v30  ;;  %2614 = vmatmul.mubr.msk.bf16.vlgmr.msra.gmra.mxu1 %vm812_vm2, %v1688_v30  ;;  %v2437_v30 = vld [vmem:[%s3692_s11] ss:$0 sm:$0xff] }
 0xaae   : > { %2625 = vmatprep.mubr.msk.bf16.mxu1 %vm3018_vm0, %v3017_v0 }
 0xafe   : > { %v1673_v31 = vpop.xlane.xlu1 %1672 }
 0xaff   : > { %2796 = vrcp.f32 %v1673_v31 }
 0xb02   : > { %v1676_v32 = vpop.xlane.xlu0 %1675 }
 0xb03   : > { %2798 = vrcp.f32 %v1676_v32  ;;  %v2438_v32 = vld [vmem:[%s3693_s12] ss:$0 sm:$0xff] }
 0xb06   : > { %v1679_v33 = vpop.xlane.xlu1 %1678  ;;  %v1841_v38 = vpop.permute.xlu0 %1840 }
 0xb07   : > { %2800 = vrcp.f32 %v1679_v33  ;;  %v1846_v41 = vsel %vm1064_vm4, %v1841_v38, 0  ;;  %v2439_v38 = vld [vmem:[%s3695_s14] ss:$0 sm:$0xff] }
 0xb0a   : > { %v1793_v34 = vpop.permute.xlu1 %1792 }
 0xb0b   : > { %v1798_v35 = vsel %vm1064_vm4, %v1793_v34, 0 }
 0xb0c   : > { %v2797_v36 = vpop.eup %2796  ;;  %2624 = vmatpush3.bf16.msra.mxu1 %v1798_v35 }
 0xb0d   : > { %v1685_v37 = vmul.f32 %v2797_v36, %v2789_v17  ;;  %2635 = vmatprep.subr.bf16.mxu1 %v3017_v0  ;;  %v2766_v36 = vld [vmem:[%s3696_s15 + $0x8] sm:$0xff]  }
 0xb0f   : > { %v1689_v39 = vpack.c.bf16 %v1685_v37, %v1685_v37  ;;  %v2767_v37 = vld [vmem:[%s3696_s15] sm:$0xff]  }
 0xb10   : > { %v2799_v40 = vpop.eup %2798 }
 0xb11   : > { %1693 = vst.msk [vmem:[%s3491_s24 + $0x4] sm:$0xf] %vm1054_vm5, %v1689_v39  ;;  %2620 = vmatmul.mubr.msk.bf16.vlgmr.msra.gmra.mxu0 %vm812_vm2, %v1689_v39  ;;  %v1686_v42 = vmul.f32 %v2799_v40, %v2791_v23  ;;  %v2762_v23 = vld [vmem:[#allocation7 + $0x8] sm:$0xff]  }
 0xb12   : > { %2630 = vmatpush3.bf16.msra.mxu0 %v1846_v41  ;;  %2631 = vmatprep.mubr.msk.bf16.mxu0 %vm3018_vm0, %v3017_v0 }
 0xb13   : > { %v1690_v43 = vpack.c.bf16 %v1686_v42, %v1686_v42  ;;  %2643 = vmatprep.subr.bf16.mxu0 %v3017_v0 }
 0xb14   : > { %v2801_v44 = vpop.eup %2800 }
 0xb15   : > { %1694 = vst.msk [vmem:[%s3491_s24 + $0x8] sm:$0xf] %vm1054_vm5, %v1690_v43  ;;  %2626 = vmatmul.mubr.msk.bf16.vlgmr.msra.gmra.mxu1 %vm812_vm2, %v1690_v43  ;;  %v1687_v45 = vmul.f32 %v2801_v44, %v2793_v25  ;;  %v2765_v25 = vld [vmem:[%s3696_s15 + $0x10] sm:$0xff]  }
 0xb16   : > { %2639 = vmatprep.mubr.msk.bf16.mxu1 %vm3018_vm0, %v3017_v0  ;;  %2636 = vmatpush3.bf16.msra.mxu1 %v2760_v51 }
 0xb17   : > { %v1691_v46 = vpack.c.bf16 %v1687_v45, %v1687_v45  ;;  %2637 = vmatprep.subr.bf16.mxu1 %v3017_v0 }
 0xb19   : > { %1695 = vst.msk [vmem:[%s3491_s24 + $0xc] sm:$0xf] %vm1054_vm5, %v1691_v46  ;;  %2632 = vmatmul.mubr.msk.bf16.vlgmr.msra.gmra.mxu0 %vm812_vm2, %v1691_v46 }
 0xb1a   : > { %2647 = vmatprep.mubr.msk.bf16.mxu0 %vm3018_vm0, %v3017_v0  ;;  %2638 = vmatpush3.bf16.msra.mxu1 %v2761_v52 }
 0xb1b   : > { %2651 = vmatprep.subr.bf16.mxu1 %v3017_v0  ;;  %2644 = vmatpush3.bf16.msra.mxu0 %v2762_v23 }
 0xb1c   : > { %2645 = vmatprep.subr.bf16.mxu0 %v3017_v0 }
 0xb1f   : > { %2646 = vmatpush3.bf16.msra.mxu0 %v2763_v24 }
 0xb6d   : > { %v1738_v47 = vpop.f32.mrf.mxu1 }
 0xb6f   : > { %v2615_v48 = vpop.f32.mrf.mxu1 }
 0xb71   : > { %v1741_v49 = vpop.f32.mrf.mxu1 }
 0xb73   : > { %v2616_v50 = vpop.f32.mrf.mxu1 }
 0xbd1   : > { %v1786_v53 = vpop.f32.mrf.mxu0 }
 0xbd2   : > { %1889 = vrot.lane.b32.xlu1 %v1786_v53, %s3767_s5  ;;  %s2890_s5 = sshll.u32 %s3028_s30, 4  ;;  %s2891_s5 = int_to_ptr.vmem [resolvable:$false] %s2890_s5 }
 0xbd3   : > { %v2621_v54 = vpop.f32.mrf.mxu0  ;;  %s2892_s22 = scalar_lea.vmem %s2891_s5, 512  ;;  %p2893_p6 = scmp.lt.s32.totalorder %s3579_s4, %s2891_s5 }
 0xbd4   : > { %p2894_p12 = scmp.lt.s32.totalorder %s2892_s22, %s2886_s2 }
 0xbd5   : > { %v1789_v55 = vpop.f32.mrf.mxu0  ;;  %v1834_v56 = vpop.f32.mrf.mxu1 }
 0xbd6   : > { %1893 = vrot.lane.b32.xlu0 %v1834_v56, %s3768_s23  ;;  %s2188_s23 = sand.u32 1, %s3163_s3   ;;  %p2895_p7 = por %p2894_p12, %p2893_p6 }
 0xbd7   : > { %v2622_v57 = vpop.f32.mrf.mxu0  ;;  %v2627_v58 = vpop.f32.mrf.mxu1  ;;  %s3581_s13 = scalar_lea.sflag [#allocation10], %s2188_s23 }
 0xbd8   : > { %p2896_p9 = pnand %p2895_p7, %p2889_p2 }
 0xbd9   : > { %v1837_v59 = vpop.f32.mrf.mxu1  ;;  %v1882_v60 = vpop.f32.mrf.mxu0 }
 0xbda   : > { %1897 = vrot.lane.b32.xlu1 %v1882_v60, %s3769_s28  ;;  %s3725_s28 = sshll.u32 %s3163_s3, 8 }
 0xbdb   : > { %v2628_v61 = vpop.f32.mrf.mxu1  ;;  %v2633_v62 = vpop.f32.mrf.mxu0  ;;  %s3576_s17 = scalar_lea.hbm %s3701_s20, %s3725_s28 }
 0xbdd   : > { %v1885_v63 = vpop.f32.mrf.mxu0 }
 0xbdf   : > { %v2634_v1 = vpop.f32.mrf.mxu0 }
 0xc44   : > { %v1890_v2 = vpop.permute.xlu1 %1889 }
 0xc45   : > { %v1900_v5 = vsel %vm812_vm2, %v1738_v47, %v1890_v2 }
 0xc48   : > { %v1894_v4 = vpop.permute.xlu0 %1893 }
 0xc49   : > { %v1901_v6 = vsel %vm1265_vm6, %v1900_v5, %v1894_v4 }
 0xc4c   : > { %v1898_v7 = vpop.permute.xlu1 %1897 }
 0xc4d   : > { %v1902_v8 = vsel %vm1267_vm7, %v1901_v6, %v1898_v7 }
 0xc4e   : > { %v1903_v9 = vpack.c.bf16 %v1902_v8, %v1902_v8 }
 0xc50   : > { %2640 = vmatmul.mubr.msk.bf16.vlgmr.msra.gmra.mxu1 %vm751_vm1, %v1903_v9 }
 0xc51   : > { %2659 = vmatprep.mubr.msk.bf16.mxu1 %vm3018_vm0, %v3017_v0 }
 0xd10   : > { %v1964_v11 = vpop.f32.mrf.mxu1 }
 0xd11   : > { %v1965_v12 = vadd.f32 %v2433_v10, %v1964_v11 }
 0xd12   : > { %v2641_v3 = vpop.f32.mrf.mxu1 }
 0xd13   : > { %v1970_v13 = vadd.f32 %v1965_v12, %v3426_v22  ;;  %v2764_v22 = vld [vmem:[%s3696_s15 + $0x18] sm:$0xff]  }
 0xd14   : > { %v1967_v14 = vpop.f32.mrf.mxu1  ;;  %2652 = vmatpush3.bf16.msra.mxu1 %v2764_v22 }
 0xd15   : > { %v1973_v15 = vsel %vm751_vm1, %v1970_v13, 0.0  ;;  %2653 = vmatprep.subr.bf16.mxu1 %v3017_v0 }
 0xd16   : > { %1974 = vadd.xlane.f32.xlu0 %v1973_v15  ;;  %v2642_v18 = vpop.f32.mrf.mxu1 }
 0xd18   : > { %2654 = vmatpush3.bf16.msra.mxu1 %v2765_v25 }
 0xd19   : > { %2655 = vmatprep.subr.bf16.mxu1 %v3017_v0 }
 0xd1c   : > { %2656 = vmatpush3.bf16.msra.mxu1 %v2766_v36 }
 0xd1d   : > { %2657 = vmatprep.subr.bf16.mxu1 %v3017_v0  ;;  %v2443_v0 = vld [vmem:[%s3697_s16] ss:$0 sm:$0xff] }
 0xd20   : > { %2658 = vmatpush3.bf16.msra.mxu1 %v2767_v37 }
 0xd9f   : > { %v1975_v19 = vpop.xlane.xlu0 %1974 }
 0xda0   : > { %v1976_v20 = vmul.f32 0.03125, %v1975_v19 }
 0xda2   : > { %v1977_v21 = vsub.f32 %v1970_v13, %v1976_v20 }
 0xda4   : > { %v1978_v17 = vmul.f32 %v1977_v21, %v1977_v21 }
 0xda6   : > { %v1979_v16 = vsel %vm751_vm1, %v1978_v17, 0.0 }
 0xda7   : > { %1980 = vadd.xlane.f32.xlu1 %v1979_v16 }
 0xe30   : > { %v1981_v26 = vpop.xlane.xlu1 %1980 }
 0xe31   : > { %v1982_v27 = vmul.f32 0.03125, %v1981_v26 }
 0xe33   : > { %v1983_v28 = vadd.f32 1e-05, %v1982_v27 }
 0xe35   : > { %2802 = vrsqrt.f32 %v1983_v28 }
 0xe42   : > { %v2803_v29 = vpop.eup %2802 }
 0xe43   : > { %v1985_v31 = vmul.f32 %v2803_v29, %v1977_v21 }
 0xe45   : > { %v1992_v33 = vmul.f32 %v2437_v30, %v1985_v31 }
 0xe47   : > { %v1999_v34 = vadd.f32 %v2438_v32, %v1992_v33 }
 0xe49   : > { %v2000_v35 = vpack.c.bf16 %v1999_v34, %v1999_v34 }
 0xe4b   : > { %2648 = vmatmul.mubr.msk.bf16.vlgmr.msra.gmra.mxu0 %vm751_vm1, %v2000_v35 }
 0xf0b   : > { %v2061_v39 = vpop.f32.mrf.mxu0 }
 0xf0c   : > { %v2062_v40 = vadd.f32 %v2439_v38, %v2061_v39 }
 0xf0d   : > { %v2649_v41 = vpop.f32.mrf.mxu0 }
 0xf0e   : > { %v2067_v42 = vmax.f32 %v2062_v40, 0.0 }
 0xf0f   : > { %v2064_v43 = vpop.f32.mrf.mxu0 }
 0xf10   : > { %v2068_v44 = vpack.c.bf16 %v2067_v42, %v2067_v42 }
 0xf11   : > { %v2650_v45 = vpop.f32.mrf.mxu0 }
 0xf12   : > { %2660 = vmatmul.mubr.msk.bf16.vlgmr.msra.gmra.mxu1 %vm2108_vm8, %v2068_v44 }
 0xfd2   : > { %v2146_v46 = vpop.f32.mrf.mxu1 }
 0xfd3   : > { %v2147_v47 = vadd.f32 %v2443_v0, %v2146_v46 }
 0xfd4   : > { %v2661_v48 = vpop.f32.mrf.mxu1 }
 0xfd5   : > { %v2152_v49 = vadd.f32 %v2147_v47, %v1999_v34 }
 0xfd6   : > { %v2149_v50 = vpop.f32.mrf.mxu1 }
 0xfd7   : > { %v2155_v51 = vsel %vm751_vm1, %v2152_v49, 0.0 }
 0xfd8   : > { %2156 = vadd.xlane.f32.xlu0 %v2155_v51  ;;  %v2662_v52 = vpop.f32.mrf.mxu1 }
0x1061   : > { %v2157_v53 = vpop.xlane.xlu0 %2156 }
0x1062   : > { %v2158_v54 = vmul.f32 0.03125, %v2157_v53 }
0x1064   : > { %v3564_v55 = vsub.f32 %v2152_v49, %v2158_v54 }
0x1066   : > { %v2160_v56 = vmul.f32 %v3564_v55, %v3564_v55 }
0x1068   : > { %v2161_v57 = vsel %vm751_vm1, %v2160_v56, 0.0 }
0x1069   : > { %2162 = vadd.xlane.f32.xlu0 %v2161_v57 }
0x106a   : > { %2899 = shalt.err (!%p2896_p9)
}
0x106b   : > { %s2900_s27 = scalar_lea.hbm %s3576_s17, 256  ;;  %s2904_s1 = scalar_lea.hbm %s3701_s20, 512 }
0x106c   : > { %p2901_p13 = scmp.ne.s32.totalorder %s3576_s17, %s2900_s27  ;;  %p2905_p0 = scmp.lt.s32.totalorder %s3576_s17, %s3701_s20 }
0x106d   : > { %p2906_p4 = scmp.lt.s32.totalorder %s2904_s1, %s2900_s27 }
0x106e   : > { %p2902_p5 = pnand %p2901_p13, %p3770_p11 }
0x106f   : > { %p2907_p8 = por %p2906_p4, %p2905_p0 }
0x1070   : > { %p2903_p10 = pneg %p2902_p5 }
0x1072   : > { %p2908_p3 = pnand %p2907_p8, %p2903_p10 }
0x1074   : > { %2911 = shalt.err (!%p2908_p3)
}
0x1075   : > { %s3029_s22 = smov 4   ;;  %s3771_s2 = smov 64  }
0x1076   : > { %2674 = dma.vmem_to_hbm [thread:$0]  (%p3770_p11), %s3579_s4, 256, %s3576_s17, %s3581_s13, %s3771_s2, %s3771_s2, %s3029_s22  }
0x1077   : > { %s3772_s5 = sshll.u32 %s3163_s3, 8  ;;  %s2236_s0 = sshll.u32 %s3491_s24, 4  ;;  %s2237_s0 = int_to_ptr.vmem [resolvable:$true] %s2236_s0 }
0x1078   : > { %s3612_s27 = scalar_lea.hbm %s3702_s21, %s3772_s5  ;;  %s2912_s1 = scalar_lea.vmem %s2237_s0, 256 }
0x1079   : > { %p2913_p1 = scmp.ne.s32.totalorder %s2237_s0, %s2912_s1  ;;  %s3030_s30 = smov [#allocation11]  }
0x107a   : > { %s2916_s6 = sshll.u32 %s3030_s30, 4  ;;  %s2917_s6 = int_to_ptr.vmem [resolvable:$false] %s2916_s6 }
0x107b   : > { %p2914_p2 = pnand %p2913_p1, %p3770_p11  ;;  %s2918_s7 = scalar_lea.vmem %s2917_s6, 512 }
0x107c   : > { %p2919_p12 = scmp.lt.s32.totalorder %s2237_s0, %s2917_s6  ;;  %p2920_p7 = scmp.lt.s32.totalorder %s2918_s7, %s2912_s1 }
0x107d   : > { %p2915_p6 = pneg %p2914_p2 }
0x107e   : > { %p2921_p9 = por %p2920_p7, %p2919_p12 }
0x1080   : > { %p2922_p13 = pnand %p2921_p9, %p2915_p6 }
0x1082   : > { %2925 = shalt.err (!%p2922_p13)
}
0x1083   : > { %s2926_s24 = scalar_lea.hbm %s3612_s27, 256  ;;  %s2930_s5 = scalar_lea.hbm %s3702_s21, 512 }
0x1084   : > { %p2927_p5 = scmp.ne.s32.totalorder %s3612_s27, %s2926_s24  ;;  %p2931_p4 = scmp.lt.s32.totalorder %s3612_s27, %s3702_s21 }
0x1085   : > { %p2932_p8 = scmp.lt.s32.totalorder %s2930_s5, %s2926_s24 }
0x1086   : > { %p2928_p10 = pnand %p2927_p5, %p3770_p11 }
0x1087   : > { %p2933_p3 = por %p2932_p8, %p2931_p4 }
0x1088   : > { %p2929_p0 = pneg %p2928_p10 }
0x108a   : > { %p2934_p1 = pnand %p2933_p3, %p2929_p0 }
0x108c   : > { %2937 = shalt.err (!%p2934_p1)
}
0x108d   : > { %2675 = dma.vmem_to_hbm [thread:$0]  (%p3770_p11), %s2237_s0, 256, %s3612_s27, %s3581_s13, %s3771_s2, %s3771_s2, %s3029_s22  }
0x108e   : > { %s2400_s6 = sshll.u32 %s3262_s26, 3  ;;  %s3773_s30 = sld [smem:[#allocation32_spill]] }
0x108f   : > { %s3774_s4 = sld [smem:[#allocation33_spill]]  ;;  %s2454_s5 = sshll.u32 %s3163_s3, 7 }
0x1090   : > { %s704_s13 = scalar_lea.vmem [#allocation8], %s2400_s6  ;;  %s3775_s0 = sld [smem:[#allocation34_spill]] }
0x1091   : > { %s2207_s22 = sshll.u32 %s704_s13, 4  ;;  %s2184_s23 = scalar_lea.sflag [#allocation4], %s3262_s26  ;;  %s2208_s22 = int_to_ptr.vmem [resolvable:$true] %s2207_s22 }
0x1092   : > { %s2938_s7 = scalar_lea.vmem %s2208_s22, 128  ;;  %s3031_s1 = smov [#allocation8]  }
0x1093   : > { %p2939_p2 = scmp.ne.s32.totalorder %s2208_s22, %s2938_s7 }
0x1094   : > { %v2449_v62 = vld [vmem:[%s3773_s30] ss:$0 sm:$0xff]  ;;  %s2942_s30 = sshll.u32 %s3031_s1, 4  ;;  %s2943_s30 = int_to_ptr.vmem [resolvable:$false] %s2942_s30 }
0x1095   : > { %v2450_v1 = vld [vmem:[%s3774_s4] ss:$0 sm:$0xff]  ;;  %p2940_p6 = pnand %p2939_p2, %p3770_p11  ;;  %s2944_s3 = scalar_lea.vmem %s2943_s30, 256 }
0x1096   : > { %s2205_s28 = scalar_lea.hbm %s3775_s0, %s2454_s5  ;;  %p2945_p7 = scmp.lt.s32.totalorder %s2208_s22, %s2943_s30 }
0x1097   : > { %p2941_p12 = pneg %p2940_p6  ;;  %p2946_p9 = scmp.lt.s32.totalorder %s2944_s3, %s2938_s7 }
0x1099   : > { %p2947_p13 = por %p2946_p9, %p2945_p7 }
0x109b   : > { %p2948_p5 = pnand %p2947_p13, %p2941_p12 }
0x10f2   : > { %v2163_v58 = vpop.xlane.xlu0 %2162 }
0x10f3   : > { %v2164_v59 = vmul.f32 0.03125, %v2163_v58 }
0x10f5   : > { %v2165_v60 = vadd.f32 1e-05, %v2164_v59 }
0x10f7   : > { %2804 = vrsqrt.f32 %v2165_v60 }
0x1104   : > { %v2805_v61 = vpop.eup %2804 }
0x1105   : > { %v2167_v63 = vmul.f32 %v2805_v61, %v3564_v55 }
0x1107   : > { %v2174_v2 = vmul.f32 %v2449_v62, %v2167_v63 }
0x1109   : > { %v2181_v4 = vadd.f32 %v2450_v1, %v2174_v2 }
0x110b   : > { %2182 = vst.msk [vmem:[%s704_s13] sm:$0xff] %vm751_vm1, %v2181_v4 }
0x110c   : > { %2951 = shalt.err (!%p2948_p5)
}
0x110d   : > { %s2952_s6 = scalar_lea.hbm %s2205_s28, 128  ;;  %s2956_s17 = scalar_lea.hbm %s3775_s0, 256 }
0x110e   : > { %p2953_p10 = scmp.ne.s32.totalorder %s2205_s28, %s2952_s6  ;;  %p2957_p8 = scmp.lt.s32.totalorder %s2205_s28, %s3775_s0 }
0x110f   : > { %p2958_p3 = scmp.lt.s32.totalorder %s2956_s17, %s2952_s6 }
0x1110   : > { %p2954_p0 = pnand %p2953_p10, %p3770_p11 }
0x1111   : > { %p2959_p1 = por %p2958_p3, %p2957_p8 }
0x1112   : > { %p2955_p4 = pneg %p2954_p0 }
0x1114   : > { %p2960_p2 = pnand %p2959_p1, %p2955_p4 }
0x1116   : > { %2963 = shalt.err (!%p2960_p2)
}
0x1117   : > { %2673 = dma.vmem_to_hbm [thread:$0]  (%p3770_p11), %s2208_s22, 128, %s2205_s28, %s2184_s23  }
0x1118 PF: > { %s3776_s13 = sld [smem:[#allocation16_spill]] }
0x1119   : > { %s3777_s2 = sld [smem:[#allocation19_spill]] }
0x111a   : > { %s3778_s27 = sld [smem:[#allocation18_spill]] }
0x111e   : > { %s2251_s7 = sand.u32 1, %s3776_s13  }
0x111f   : > { %p3779_p6 = scmp.ne.s32.totalorder %s3777_s2, 0  ;;  %s2252_s1 = scalar_lea.sflag [#allocation4], %s2251_s7 }
0x1120   : > { %p3780_p12 = scmp.ge.s32.totalorder %s3778_s27, 2 }
0x1122   : > { %p2691_p7 = pnand %p3780_p12, %p3779_p6 }
0x1124   : > { %p2692_p9 = pneg %p2691_p7 }
0x1126   : > { %2989 = dma.done.wait (%p2692_p9), %s2252_s1, 128  }
0x1127   : > { %2991 = vsyncadd (%p2692_p9), %s2252_s1, 4294967168  ;;  %s3781_s30 = sadd.s32 4294967294, %s3778_s27  }
0x1128   : > { %s2260_s3 = sand.u32 1, %s3781_s30  }
0x1129   : > { %s2261_s6 = scalar_lea.sflag [#allocation10], %s2260_s3 }
0x112a   : > { %2993 = dma.done.wait (%p2692_p9), %s2261_s6, 512  }
0x112b   : > { %2995 = vsyncadd (%p2692_p9), %s2261_s6, 4294966784  ;;  %s3782_s27 = sld [smem:[#allocation20_spill]]  ;;  %s3785_s2 = smov %s3002_s25 }
0x112c   : > { %s3783_s19 = sld [smem:[#allocation17_spill]] }
0x112d   : > { %s3784_s26 = sld [smem:[#allocation21_spill]] }
0x1131   : > { %p39_p11 = scmp.ge.s32.totalorder %s3782_s27, 4  }
0x1132   : > { %s3786_s25 = smov %s3783_s19 }
0x1133   :  { %41 = sbr.rel (!%p39_p11) target bundleno = 22 (0x16), region = 181 }
0x1138   :  { %2275 = vsyncpa [#allocation3], 1 }
0x1139   :  { %2277 = vsyncpa [#allocation3 + $0x1], 1 }
0x113a   :  { %2278 = vsyncpa [#allocation6], 1 }
0x113b   :  { %2279 = vsyncpa [#allocation4], 1 }
0x113c   :  { %2281 = vsyncpa [#allocation4 + $0x1], 1 }
0x113d   :  { %2282 = vsyncpa [#allocation10], 1 }
0x113e   :  { %2284 = vsyncpa [#allocation10 + $0x1], 1 }

</bundles_post_ra>
